<compile_context>
chip_gen: v7x
topology: tpu7x:2x2x1
jax: 0.10.0
libtpu: 0.0.40
codegen_flags: <defaults>
</compile_context>

<pallas_src>
import functools

import jax
import jax.numpy as jnp
from jax import lax
from jax.experimental import pallas as pl
from jax.experimental.pallas import tpu as pltpu

_INV_SQRT2 = 0.7071067811865476


# ----------------------------------------------------------------------------
# Kernels
# ----------------------------------------------------------------------------
def _gelu(h, exact):
    if exact:
        # Exact GELU (torch.nn.GELU default): 0.5*x*(1+erf(x/sqrt(2))), in f32.
        return 0.5 * h * (1.0 + lax.erf(h * _INV_SQRT2))
    # tanh approximation (EUP-friendly on v6e/v7x); changes numerics slightly.
    return jax.nn.gelu(h, approximate=True)


def _ffn_kernel_fullh(x_ref, w1_ref, b1_ref, w2_ref, b2_ref, o_ref,
                      *, exact_gelu):
    """Full hidden dim resident: one pass, no accumulator round-trip."""
    h = jnp.dot(x_ref[...], w1_ref[...], preferred_element_type=jnp.float32)
    h = _gelu(h + b1_ref[...].astype(jnp.float32), exact_gelu)
    # Dropout(p=0) is the identity -> nothing to do.
    y = jnp.dot(h.astype(w2_ref.dtype), w2_ref[...],
                preferred_element_type=jnp.float32)
    y = (y + b2_ref[...].astype(jnp.float32)
         + x_ref[...].astype(jnp.float32))            # residual add in f32
    o_ref[...] = y.astype(o_ref.dtype)


def _ffn_kernel_htiled(x_ref, w1_ref, b1_ref, w2_ref, b2_ref, o_ref, acc_ref,
                       *, exact_gelu):
    """Hidden dim tiled over grid axis 1 (>= 2 steps, enforced by wrapper).

    f32 accumulator scratch; the last slab's partial product is fused with the
    epilogue (no extra acc store+reload on the final step).
    """
    hj = pl.program_id(1)
    last = pl.num_programs(1) - 1

    h = jnp.dot(x_ref[...], w1_ref[...], preferred_element_type=jnp.float32)
    h = _gelu(h + b1_ref[...].astype(jnp.float32), exact_gelu)
    partial = jnp.dot(h.astype(w2_ref.dtype), w2_ref[...],
                      preferred_element_type=jnp.float32)

    @pl.when(hj == 0)
    def _():
        acc_ref[...] = partial

    @pl.when(jnp.logical_and(hj > 0, hj < last))
    def _():
        acc_ref[...] += partial

    @pl.when(hj == last)   # last >= 1 guaranteed by the wrapper
    def _():
        y = (acc_ref[...] + partial + b2_ref[...].astype(jnp.float32)
             + x_ref[...].astype(jnp.float32))
        o_ref[...] = y.astype(o_ref.dtype)


# ----------------------------------------------------------------------------
# Config helpers (generation-aware VMEM budgeting, tile selection)
# ----------------------------------------------------------------------------
def _round_up(a, b):
    return -(-a // b) * b


def _vmem_capacity_bytes():
    try:
        info = pltpu.get_tpu_info()
        cap = getattr(info, "vmem_capacity_bytes", None)
        if cap:
            return int(cap)
    except Exception:
        pass
    return 64 * 1024 * 1024  # conservative (v7x per-TensorCore)


def _vmem_need_bytes(tm, e, h_total, th, dtype_bytes, weight_buffers):
    """Rough VMEM footprint model used to pick th and vmem_limit_bytes."""
    act = 2 * (tm * e * dtype_bytes) * 2                 # x + out, double-buffered
    wbuf = weight_buffers if th == h_total else 2        # streamed slabs stay 2-deep
    w = (2 * e * th + th + e) * dtype_bytes * wbuf       # W1 slab + W2 slab + biases
    h_tmp = tm * th * (4 + dtype_bytes)                  # f32 hidden tile + cast copy
    acc = 0 if th == h_total else tm * e * 4             # f32 accumulator
    return act + w + h_tmp + acc


def _select_th(e, h_total, tm, dtype_bytes, budget, weight_buffers):
    """Largest hidden slab (multiple of 128, divisor of H) that fits the budget."""
    if (_vmem_need_bytes(tm, e, h_total, h_total, dtype_bytes, weight_buffers)
            <= budget) or h_total % 128 != 0:
        return h_total  # full residency (best default; forced if H % 128 != 0)
    cands = [c for c in range(128, h_total, 128) if h_total % c == 0]
    for c in sorted(cands, reverse=True):
        if _vmem_need_bytes(tm, e, h_total, c, dtype_bytes, weight_buffers) <= budget:
            return c
    return cands[0] if cands else h_total


def _select_tm(n, tm_req):
    """Token tile: multiple of 16 (bf16 packing), >= 2 tiles when possible."""
    if n <= 16:
        return n                       # block dim == full dim is always legal
    tm = min(_round_up(tm_req, 16), _round_up(n, 16))
    if -(-n // tm) < 2:                # ensure >=2 token tiles (v7x megacore,
        tm = _round_up(-(-n // 2), 16)  # and DMA/compute overlap)
    return tm


# ----------------------------------------------------------------------------
# pallas_call wrapper
# ----------------------------------------------------------------------------
@functools.partial(
    jax.jit,
    static_argnames=("tm", "th", "exact_gelu", "weight_buffers",
                     "vmem_limit_bytes"))
def _ffn_pallas(x2d, w1, b1_2d, w2, b2_2d, *, tm, th, exact_gelu,
                weight_buffers, vmem_limit_bytes):
    n, e = x2d.shape
    h_total = w1.shape[1]
    n_tiles = pl.cdiv(n, tm)
    h_tiles = h_total // th
    db = x2d.dtype.itemsize

    weight_bytes = (2 * e * h_total + h_total + e) * w1.dtype.itemsize
    cost = pl.CostEstimate(
        flops=4 * n * e * h_total,                       # two matmuls
        transcendentals=n * h_total,                     # erf / tanh per hidden elem
        bytes_accessed=int(2 * n * e * db
                           + (1 if h_tiles == 1 else n_tiles) * weight_bytes))

    if h_tiles == 1:
        # ----- full-H path: weights resident, no accumulator -----------------
        if weight_buffers == 1:
            def wspec(shape):
                return pl.BlockSpec(shape, lambda i: (0, 0),
                                    pipeline_mode=pl.Buffered(1))
        else:
            def wspec(shape):
                return pl.BlockSpec(shape, lambda i: (0, 0))

        grid_spec = pltpu.PrefetchScalarGridSpec(
            num_scalar_prefetch=0,
            grid=(n_tiles,),
            in_specs=[
                pl.BlockSpec((tm, e), lambda i: (i, 0)),   # x tile
                wspec((e, h_total)),                       # W1 (resident)
                wspec((1, h_total)),                       # b1
                wspec((h_total, e)),                       # W2 (resident)
                wspec((1, e)),                             # b2
            ],
            out_specs=pl.BlockSpec((tm, e), lambda i: (i, 0)),
        )
        kernel = functools.partial(_ffn_kernel_fullh, exact_gelu=exact_gelu)
        dims = ("parallel",)
    else:
        # ----- H-tiled path: weight slabs streamed, f32 accumulator ----------
        grid_spec = pltpu.PrefetchScalarGridSpec(
            num_scalar_prefetch=0,
            grid=(n_tiles, h_tiles),
            in_specs=[
                pl.BlockSpec((tm, e), lambda i, j: (i, 0)),    # x tile
                pl.BlockSpec((e, th), lambda i, j: (0, j)),    # W1 slab
                pl.BlockSpec((1, th), lambda i, j: (0, j)),    # b1 slab
                pl.BlockSpec((th, e), lambda i, j: (j, 0)),    # W2 slab
                pl.BlockSpec((1, e), lambda i, j: (0, 0)),     # b2
            ],
            out_specs=pl.BlockSpec((tm, e), lambda i, j: (i, 0)),
            scratch_shapes=[pltpu.VMEM((tm, e), jnp.float32)],  # f32 acc
        )
        kernel = functools.partial(_ffn_kernel_htiled, exact_gelu=exact_gelu)
        dims = ("parallel", "arbitrary")

    return pl.pallas_call(
        kernel,
        out_shape=jax.ShapeDtypeStruct((n, e), x2d.dtype),
        grid_spec=grid_spec,
        compiler_params=pltpu.CompilerParams(
            dimension_semantics=dims,
            vmem_limit_bytes=vmem_limit_bytes),
        cost_estimate=cost,
    )(x2d, w1, b1_2d, w2, b2_2d)


_SINGLE_BUFFER_OK = None  # memoized: does this jax build accept pl.Buffered(1)?


def feed_forward_block(x, w1, b1, w2, b2, *, tm=512, th=None, exact_gelu=True):
    """x: (B, S, E) -> (B, S, E).  Weights: w1 (E,H), b1 (H,), w2 (H,E), b2 (E,).

    tm: requested token tile (auto-rounded / shrunk so >=2 tiles when possible).
    th: hidden-dim slab; None = auto (full H if it fits the VMEM budget,
        otherwise the largest multiple of 128 dividing H that does).
    """
    b, s, e = x.shape
    h_total = w1.shape[1]
    n = b * s
    dtype_bytes = jnp.dtype(x.dtype).itemsize

    cap = _vmem_capacity_bytes()
    budget = int(cap * 0.70)

    tm_eff = _select_tm(n, tm)
    if th is None:
        th_eff = _select_th(e, h_total, tm_eff, dtype_bytes, budget,
                            weight_buffers=1)
    else:
        th_eff = th
        assert h_total % th_eff == 0, "th must divide H"
        assert th_eff == h_total or th_eff % 128 == 0, \
            "th must be a multiple of 128 (lane constraint)"

    need = _vmem_need_bytes(tm_eff, e, h_total, th_eff, dtype_bytes,
                            weight_buffers=1)
    vmem_limit = int(max(32 * 1024 * 1024, min(int(cap * 0.85), 2 * need)))

    # No jnp.pad: ragged last token tile (if any) is handled by the pipeline.
    x2d = x.reshape(n, e)
    b1_2d = b1.reshape(1, h_total)
    b2_2d = b2.reshape(1, e)

    call = functools.partial(_ffn_pallas, x2d, w1, b1_2d, w2, b2_2d,
                             tm=tm_eff, th=th_eff, exact_gelu=exact_gelu,
                             vmem_limit_bytes=vmem_limit)

    global _SINGLE_BUFFER_OK
    if _SINGLE_BUFFER_OK is None:
        try:
            out = call(weight_buffers=1)
            _SINGLE_BUFFER_OK = True
        except Exception:
            _SINGLE_BUFFER_OK = False
            out = call(weight_buffers=2)
    else:
        out = call(weight_buffers=1 if _SINGLE_BUFFER_OK else 2)

    return out.reshape(b, s, e)


def reference_ffn(x, w1, b1, w2, b2):
    """Plain-JAX f32 reference matching the PyTorch module."""
    xf = x.astype(jnp.float32)
    h = jnp.dot(xf, w1.astype(jnp.float32)) + b1.astype(jnp.float32)
    h = 0.5 * h * (1.0 + lax.erf(h * _INV_SQRT2))
    y = jnp.dot(h, w2.astype(jnp.float32)) + b2.astype(jnp.float32)
    return y + xf


if __name__ == "__main__":
    # Small transformer-token shapes, lane-dense embedding (E multiple of 128).
    B, S, E = 2, 64, 128
    expansion = 4
    H = expansion * E  # 512

    key = jax.random.PRNGKey(0)
    kx, k1, k2, k3, k4 = jax.random.split(key, 5)

    dtype = jnp.bfloat16  # bf16 operands -> native MXU path, f32 accumulation
    x = jax.random.normal(kx, (B, S, E), dtype=jnp.float32).astype(dtype)
    w1 = (jax.random.uniform(k1, (E, H), jnp.float32, -1.0, 1.0)
          / jnp.sqrt(E)).astype(dtype)
    b1 = (jax.random.uniform(k2, (H,), jnp.float32, -1.0, 1.0)
          / jnp.sqrt(E)).astype(dtype)
    w2 = (jax.random.uniform(k3, (H, E), jnp.float32, -1.0, 1.0)
          / jnp.sqrt(H)).astype(dtype)
    b2 = (jax.random.uniform(k4, (E,), jnp.float32, -1.0, 1.0)
          / jnp.sqrt(H)).astype(dtype)

    ref = reference_ffn(x, w1, b1, w2, b2)  # f32 reference

    # 1) Default config: weights fully resident, accumulator-free kernel,
    #    >= 2 token tiles so both v7x TensorCores get work.
    out = jax.block_until_ready(feed_forward_block(x, w1, b1, w2, b2))
    assert out.shape == (B, S, E)
    assert jnp.allclose(out.astype(jnp.float32), ref, atol=5e-2, rtol=5e-2), \
        "mismatch vs reference (full-H config)"

    # 2) Exercise the H-tiled (weight-streaming) reduction path.  On this tiny
    #    demo tm is auto-shrunk to 64 to keep two token tiles; production
    #    streamed-weight configs should use tm >= 384-1024 to stay MXU-bound.
    out2 = jax.block_until_ready(
        feed_forward_block(x, w1, b1, w2, b2, th=H // 2))
    assert jnp.allclose(out2.astype(jnp.float32), ref, atol=5e-2, rtol=5e-2), \
        "mismatch vs reference (H-tiled config)"

    print("KERNEL_OK")
</pallas_src>

<mosaic_0001>
module attributes {stable_mosaic.version = 11 : i64} {
  func.func @_ffn_kernel_fullh(%arg0: i32, %arg1: memref<64x128xbf16, #tpu.memory_space<vmem>>, %arg2: memref<128x512xbf16, #tpu.memory_space<vmem>>, %arg3: memref<1x512xbf16, #tpu.memory_space<vmem>>, %arg4: memref<512x128xbf16, #tpu.memory_space<vmem>>, %arg5: memref<1x128xbf16, #tpu.memory_space<vmem>>, %arg6: memref<64x128xbf16, #tpu.memory_space<vmem>>) attributes {dimension_semantics = [#tpu.dimension_semantics<parallel>], iteration_bounds = array<i64: 2>, scalar_prefetch = 0 : i64, scratch_operands = 0 : i64, tpu.core_type = #tpu.core_type<tc>, window_params = [{transform_indices = @transform_0, window_bounds = array<i64: 64, 128>}, {pipeline_mode = #tpu.pipeline_mode<synchronous>, transform_indices = @transform_1, window_bounds = array<i64: 128, 512>}, {pipeline_mode = #tpu.pipeline_mode<synchronous>, transform_indices = @transform_2, window_bounds = array<i64: 1, 512>}, {pipeline_mode = #tpu.pipeline_mode<synchronous>, transform_indices = @transform_3, window_bounds = array<i64: 512, 128>}, {pipeline_mode = #tpu.pipeline_mode<synchronous>, transform_indices = @transform_4, window_bounds = array<i64: 1, 128>}, {transform_indices = @transform_5, window_bounds = array<i64: 64, 128>}]} {
    %c0 = arith.constant 0 : index
    %c0_0 = arith.constant 0 : index
    %0 = vector.load %arg1[%c0, %c0_0] : memref<64x128xbf16, #tpu.memory_space<vmem>>, vector<64x128xbf16>
    %c0_1 = arith.constant 0 : index
    %c0_2 = arith.constant 0 : index
    %1 = vector.load %arg2[%c0_1, %c0_2] : memref<128x512xbf16, #tpu.memory_space<vmem>>, vector<128x512xbf16>
    %cst = arith.constant dense<0.000000e+00> : vector<64x512xf32>
    %2 = tpu.matmul %0, %1, %cst {dimension_numbers = #tpu.dot_dimension_numbers<[1], [0], [0], [1], [0, 0, 1, 1], [], []>} : vector<64x128xbf16>, vector<128x512xbf16>, vector<64x512xf32> -> vector<64x512xf32>
    %c0_3 = arith.constant 0 : index
    %c0_4 = arith.constant 0 : index
    %3 = vector.load %arg3[%c0_3, %c0_4] : memref<1x512xbf16, #tpu.memory_space<vmem>>, vector<1x512xbf16>
    %4 = arith.extf %3 : vector<1x512xbf16> to vector<1x512xf32>
    %5 = vector.broadcast %4 : vector<1x512xf32> to vector<64x512xf32>
    %6 = arith.addf %2, %5 : vector<64x512xf32>
    %cst_5 = arith.constant 5.000000e-01 : f32
    %7 = vector.broadcast %cst_5 : f32 to vector<64x512xf32>
    %8 = arith.mulf %7, %6 : vector<64x512xf32>
    %cst_6 = arith.constant 0.707106769 : f32
    %9 = vector.broadcast %cst_6 : f32 to vector<64x512xf32>
    %10 = arith.mulf %6, %9 : vector<64x512xf32>
    %11 = math.erf %10 : vector<64x512xf32>
    %cst_7 = arith.constant 1.000000e+00 : f32
    %12 = vector.broadcast %cst_7 : f32 to vector<64x512xf32>
    %13 = arith.addf %12, %11 : vector<64x512xf32>
    %14 = arith.mulf %8, %13 : vector<64x512xf32>
    %15 = arith.truncf %14 : vector<64x512xf32> to vector<64x512xbf16>
    %c0_8 = arith.constant 0 : index
    %c0_9 = arith.constant 0 : index
    %16 = vector.load %arg4[%c0_8, %c0_9] : memref<512x128xbf16, #tpu.memory_space<vmem>>, vector<512x128xbf16>
    %cst_10 = arith.constant dense<0.000000e+00> : vector<64x128xf32>
    %17 = tpu.matmul %15, %16, %cst_10 {dimension_numbers = #tpu.dot_dimension_numbers<[1], [0], [0], [1], [0, 0, 1, 1], [], []>} : vector<64x512xbf16>, vector<512x128xbf16>, vector<64x128xf32> -> vector<64x128xf32>
    %c0_11 = arith.constant 0 : index
    %c0_12 = arith.constant 0 : index
    %18 = vector.load %arg5[%c0_11, %c0_12] : memref<1x128xbf16, #tpu.memory_space<vmem>>, vector<1x128xbf16>
    %19 = arith.extf %18 : vector<1x128xbf16> to vector<1x128xf32>
    %20 = vector.broadcast %19 : vector<1x128xf32> to vector<64x128xf32>
    %21 = arith.addf %17, %20 : vector<64x128xf32>
    %c0_13 = arith.constant 0 : index
    %c0_14 = arith.constant 0 : index
    %22 = vector.load %arg1[%c0_13, %c0_14] : memref<64x128xbf16, #tpu.memory_space<vmem>>, vector<64x128xbf16>
    %23 = arith.extf %22 : vector<64x128xbf16> to vector<64x128xf32>
    %24 = arith.addf %21, %23 : vector<64x128xf32>
    %25 = arith.truncf %24 : vector<64x128xf32> to vector<64x128xbf16>
    %c0_15 = arith.constant 0 : index
    %c0_16 = arith.constant 0 : index
    %26 = vector.load %arg6[%c0_15, %c0_16] : memref<64x128xbf16, #tpu.memory_space<vmem>>, vector<64x128xbf16>
    tpu.vector_store %arg6[%c0_15, %c0_16], %25 {strides = array<i32>} : memref<64x128xbf16, #tpu.memory_space<vmem>>, vector<64x128xbf16>,
    return
  }
  func.func @transform_0(%arg0: i32) -> (i32, i32) {
    %c0_i32 = arith.constant 0 : i32
    %c0_i32_0 = arith.constant 0 : i32
    return %arg0, %c0_i32 : i32, i32
  }
  func.func @transform_1(%arg0: i32) -> (i32, i32) {
    %c0_i32 = arith.constant 0 : i32
    %c0_i32_0 = arith.constant 0 : i32
    %c0_i32_1 = arith.constant 0 : i32
    return %c0_i32, %c0_i32_0 : i32, i32
  }
  func.func @transform_2(%arg0: i32) -> (i32, i32) {
    %c0_i32 = arith.constant 0 : i32
    %c0_i32_0 = arith.constant 0 : i32
    %c0_i32_1 = arith.constant 0 : i32
    return %c0_i32, %c0_i32_0 : i32, i32
  }
  func.func @transform_3(%arg0: i32) -> (i32, i32) {
    %c0_i32 = arith.constant 0 : i32
    %c0_i32_0 = arith.constant 0 : i32
    %c0_i32_1 = arith.constant 0 : i32
    return %c0_i32, %c0_i32_0 : i32, i32
  }
  func.func @transform_4(%arg0: i32) -> (i32, i32) {
    %c0_i32 = arith.constant 0 : i32
    %c0_i32_0 = arith.constant 0 : i32
    %c0_i32_1 = arith.constant 0 : i32
    return %c0_i32, %c0_i32_0 : i32, i32
  }
  func.func @transform_5(%arg0: i32) -> (i32, i32) {
    %c0_i32 = arith.constant 0 : i32
    %c0_i32_0 = arith.constant 0 : i32
    return %arg0, %c0_i32 : i32, i32
  }
}

module attributes {stable_mosaic.version = 11 : i64} {
  func.func @_ffn_kernel_fullh(%arg0: i32, %arg1: memref<64x128xbf16, #tpu.memory_space<vmem>>, %arg2: memref<128x512xbf16, #tpu.memory_space<vmem>>, %arg3: memref<1x512xbf16, #tpu.memory_space<vmem>>, %arg4: memref<512x128xbf16, #tpu.memory_space<vmem>>, %arg5: memref<1x128xbf16, #tpu.memory_space<vmem>>, %arg6: memref<64x128xbf16, #tpu.memory_space<vmem>>) attributes {dimension_semantics = [#tpu.dimension_semantics<parallel>], iteration_bounds = array<i64: 2>, scalar_prefetch = 0 : i64, scratch_operands = 0 : i64, tpu.core_type = #tpu.core_type<tc>, window_params = [{transform_indices = @transform_0, window_bounds = array<i64: 64, 128>}, {pipeline_mode = #tpu.pipeline_mode<synchronous>, transform_indices = @transform_1, window_bounds = array<i64: 128, 512>}, {pipeline_mode = #tpu.pipeline_mode<synchronous>, transform_indices = @transform_2, window_bounds = array<i64: 1, 512>}, {pipeline_mode = #tpu.pipeline_mode<synchronous>, transform_indices = @transform_3, window_bounds = array<i64: 512, 128>}, {pipeline_mode = #tpu.pipeline_mode<synchronous>, transform_indices = @transform_4, window_bounds = array<i64: 1, 128>}, {transform_indices = @transform_5, window_bounds = array<i64: 64, 128>}]} {
    %c0 = arith.constant 0 : index
    %c0_0 = arith.constant 0 : index
    %0 = vector.load %arg1[%c0, %c0_0] : memref<64x128xbf16, #tpu.memory_space<vmem>>, vector<64x128xbf16>
    %c0_1 = arith.constant 0 : index
    %c0_2 = arith.constant 0 : index
    %1 = vector.load %arg2[%c0_1, %c0_2] : memref<128x512xbf16, #tpu.memory_space<vmem>>, vector<128x512xbf16>
    %cst = arith.constant dense<0.000000e+00> : vector<64x512xf32>
    %2 = tpu.matmul %0, %1, %cst {dimension_numbers = #tpu.dot_dimension_numbers<[1], [0], [0], [1], [0, 0, 1, 1], [], []>} : vector<64x128xbf16>, vector<128x512xbf16>, vector<64x512xf32> -> vector<64x512xf32>
    %c0_3 = arith.constant 0 : index
    %c0_4 = arith.constant 0 : index
    %3 = vector.load %arg3[%c0_3, %c0_4] : memref<1x512xbf16, #tpu.memory_space<vmem>>, vector<1x512xbf16>
    %4 = arith.extf %3 : vector<1x512xbf16> to vector<1x512xf32>
    %5 = vector.broadcast %4 : vector<1x512xf32> to vector<64x512xf32>
    %6 = arith.addf %2, %5 : vector<64x512xf32>
    %cst_5 = arith.constant 5.000000e-01 : f32
    %7 = vector.broadcast %cst_5 : f32 to vector<64x512xf32>
    %8 = arith.mulf %7, %6 : vector<64x512xf32>
    %cst_6 = arith.constant 0.707106769 : f32
    %9 = vector.broadcast %cst_6 : f32 to vector<64x512xf32>
    %10 = arith.mulf %6, %9 : vector<64x512xf32>
    %11 = math.erf %10 : vector<64x512xf32>
    %cst_7 = arith.constant 1.000000e+00 : f32
    %12 = vector.broadcast %cst_7 : f32 to vector<64x512xf32>
    %13 = arith.addf %12, %11 : vector<64x512xf32>
    %14 = arith.mulf %8, %13 : vector<64x512xf32>
    %15 = arith.truncf %14 : vector<64x512xf32> to vector<64x512xbf16>
    %c0_8 = arith.constant 0 : index
    %c0_9 = arith.constant 0 : index
    %16 = vector.load %arg4[%c0_8, %c0_9] : memref<512x128xbf16, #tpu.memory_space<vmem>>, vector<512x128xbf16>
    %cst_10 = arith.constant dense<0.000000e+00> : vector<64x128xf32>
    %17 = tpu.matmul %15, %16, %cst_10 {dimension_numbers = #tpu.dot_dimension_numbers<[1], [0], [0], [1], [0, 0, 1, 1], [], []>} : vector<64x512xbf16>, vector<512x128xbf16>, vector<64x128xf32> -> vector<64x128xf32>
    %c0_11 = arith.constant 0 : index
    %c0_12 = arith.constant 0 : index
    %18 = vector.load %arg5[%c0_11, %c0_12] : memref<1x128xbf16, #tpu.memory_space<vmem>>, vector<1x128xbf16>
    %19 = arith.extf %18 : vector<1x128xbf16> to vector<1x128xf32>
    %20 = vector.broadcast %19 : vector<1x128xf32> to vector<64x128xf32>
    %21 = arith.addf %17, %20 : vector<64x128xf32>
    %c0_13 = arith.constant 0 : index
    %c0_14 = arith.constant 0 : index
    %22 = vector.load %arg1[%c0_13, %c0_14] : memref<64x128xbf16, #tpu.memory_space<vmem>>, vector<64x128xbf16>
    %23 = arith.extf %22 : vector<64x128xbf16> to vector<64x128xf32>
    %24 = arith.addf %21, %23 : vector<64x128xf32>
    %25 = arith.truncf %24 : vector<64x128xf32> to vector<64x128xbf16>
    %c0_15 = arith.constant 0 : index
    %c0_16 = arith.constant 0 : index
    %26 = vector.load %arg6[%c0_15, %c0_16] : memref<64x128xbf16, #tpu.memory_space<vmem>>, vector<64x128xbf16>
    tpu.vector_store %arg6[%c0_15, %c0_16], %25 {strides = array<i32>} : memref<64x128xbf16, #tpu.memory_space<vmem>>, vector<64x128xbf16>,
    return
  }
  func.func @transform_0(%arg0: i32) -> (i32, i32) {
    %c0_i32 = arith.constant 0 : i32
    %c0_i32_0 = arith.constant 0 : i32
    return %arg0, %c0_i32 : i32, i32
  }
  func.func @transform_1(%arg0: i32) -> (i32, i32) {
    %c0_i32 = arith.constant 0 : i32
    %c0_i32_0 = arith.constant 0 : i32
    %c0_i32_1 = arith.constant 0 : i32
    return %c0_i32, %c0_i32_0 : i32, i32
  }
  func.func @transform_2(%arg0: i32) -> (i32, i32) {
    %c0_i32 = arith.constant 0 : i32
    %c0_i32_0 = arith.constant 0 : i32
    %c0_i32_1 = arith.constant 0 : i32
    return %c0_i32, %c0_i32_0 : i32, i32
  }
  func.func @transform_3(%arg0: i32) -> (i32, i32) {
    %c0_i32 = arith.constant 0 : i32
    %c0_i32_0 = arith.constant 0 : i32
    %c0_i32_1 = arith.constant 0 : i32
    return %c0_i32, %c0_i32_0 : i32, i32
  }
  func.func @transform_4(%arg0: i32) -> (i32, i32) {
    %c0_i32 = arith.constant 0 : i32
    %c0_i32_0 = arith.constant 0 : i32
    %c0_i32_1 = arith.constant 0 : i32
    return %c0_i32, %c0_i32_0 : i32, i32
  }
  func.func @transform_5(%arg0: i32) -> (i32, i32) {
    %c0_i32 = arith.constant 0 : i32
    %c0_i32_0 = arith.constant 0 : i32
    return %arg0, %c0_i32 : i32, i32
  }
}

</mosaic_0001>

<bundles_post_ra>
// kernel: _ffn_pallas.1
= control target key start
LH: loop header
LB: loop body
LE: loop exit
PB: predicated region body
PF: predicated region fallthrough
CT: control target
= control target key end

     0   :  { %10 = vsyncpa [#allocation3], 0  ;;  %s2525_s0 = inlined_call_operand.hbm [shape: bf16[128,128], index: 0, kind: input, shape index: {}]   ;;  %s2526_s1 = inlined_call_operand.hbm [shape: bf16[128,512], index: 1, kind: input, shape index: {}]   ;;  %s2527_s2 = inlined_call_operand.vmem [shape: bf16[1,512], index: 2, kind: input, shape index: {}]   ;;  %s2528_s3 = inlined_call_operand.hbm [shape: bf16[512,128], index: 3, kind: input, shape index: {}]   ;;  %s2529_s4 = inlined_call_operand.vmem [shape: bf16[1,128], index: 4, kind: input, shape index: {}]   ;;  %s2530_s5 = inlined_call_operand.hbm [shape: bf16[128,128], index: 5, kind: output, shape index: {}]  }
   0x1   :  { %12 = vsyncpa [#allocation3 + $0x1], 0 }
   0x2   :  { %13 = vsyncpa [#allocation6], 0 }
   0x3   :  { %14 = vsyncpa [#allocation4], 0 }
   0x4   :  { %16 = vsyncpa [#allocation4 + $0x1], 0  ;;  %s2046_s18 = smov 0   ;;  %s2048_s19 = smov 0  }
   0x5   :  { %s2050_s20 = smov 0   ;;  %s2052_s21 = smov 0  }
   0x6 LB: > { %s2067_s22 = sadd.s32 4294967295, %s2003_s21   ;;  %s1414_s23 = sadd.s32 4294967294, %s2003_s21   ;;  %s2003_s21 = sphi %s2052_s21, %s2550_s21   ;;  %s1999_s20 = sphi %s2050_s20, %s2549_s20   ;;  %s1995_s19 = sphi %s2048_s19, %s2548_s19   ;;  %s1991_s18 = sphi %s2046_s18, %s2547_s18  }
   0x7   : > { %p42_p0 = scmp.ne.s32.totalorder %s1995_s19, %s1991_s18  ;;  %p2531_p1 = scmp.eq.s32.totalorder %s2067_s22, 0 }
   0x8   : > { %p156_p3 = scmp.eq.s32.totalorder %s1414_s23, 1  ;;  %p1415_p5 = scmp.ge.s32.totalorder %s2003_s21, 1 }
   0x9   : > { %p2076_p4 = por %p2531_p1, %p42_p0  ;;  %p163_p7 = scmp.lt.s32.totalorder %s2003_s21, 3 }
   0xa   : > { %p2081_p6 = por %p156_p3, %p42_p0  ;;  %s2005_s27 = smov [#allocation5]  }
   0xb   : > { %s2534_s24 = scalar_select %p2076_p4, 1, 0 }
   0xc   : > { %s2535_s25 = scalar_select %p2081_p6, 1, 0 }
   0xd   : > { %p2086_p8 = pnand %p1415_p5, %p163_p7  ;;  %s175_s28 = sshll.u32 %s2005_s27, 4  ;;  %s2090_s28 = int_to_ptr.vmem [resolvable:$true] %s175_s28 }
   0xe   : > { %s2006_s30 = smov [#allocation7]   ;;  %s1847_s9 = scalar_lea.hbm %s2526_s1, 4096 }
   0xf   : > { %p1633_p9 = pneg %p2086_p8  ;;  %s191_s6 = sshll.u32 %s2006_s30, 4  ;;  %s2101_s6 = int_to_ptr.vmem [resolvable:$true] %s191_s6 }
  0x10   : > { %p1848_p12 = scmp.ne.s32.totalorder %s2526_s1, %s1847_s9  ;;  %p1854_p5 = scmp.lt.u32.totalorder %s1847_s9, %s2526_s1 }
  0x11   : > { %p2097_p11 = pnand %p1633_p9, %p2531_p1 }
  0x13   : > { %p1849_p13 = pneg %p2097_p11 }
  0x15   : > { %p1850_p0 = pnand %p1849_p13, %p1848_p12 }
  0x17   : > { %p1851_p3 = pneg %p1850_p0 }
  0x19   : > { %p1856_p7 = pnand %p1854_p5, %p1851_p3 }
  0x1b   : > { %1859 = shalt.err (!%p1856_p7)
}
  0x1c   : > { %s1860_s14 = scalar_lea.vmem %s2090_s28, 4096  ;;  %p1868_p2 = scmp.lt.s32.totalorder %s2090_s28, %s2090_s28 }
  0x1d   : > { %p1861_p9 = scmp.ne.s32.totalorder %s2090_s28, %s1860_s14  ;;  %p1869_p12 = scmp.lt.s32.totalorder %s1860_s14, %s1860_s14 }
  0x1f   : > { %p1863_p10 = pnand %p1861_p9, %p1849_p13  ;;  %p1870_p0 = por %p1869_p12, %p1868_p2 }
  0x21   : > { %p1864_p1 = pneg %p1863_p10 }
  0x23   : > { %p1871_p6 = pnand %p1870_p0, %p1864_p1 }
  0x25   : > { %1874 = shalt.err (!%p1871_p6)
}
  0x26   : > { %s2007_s15 = smov 256   ;;  %s2008_s16 = smov 16  }
  0x27   : > { %1636 = dma.hbm_to_vmem [thread:$0]  (!%p2097_p11), %s2526_s1, 4096, %s2090_s28, [#allocation6], %s2007_s15, %s2007_s15, %s2008_s16  }
  0x28   : > { %s1875_s7 = scalar_lea.hbm %s2528_s3, 4096 }
  0x29   : > { %p1876_p2 = scmp.ne.s32.totalorder %s2528_s3, %s1875_s7  ;;  %p1882_p10 = scmp.lt.u32.totalorder %s1875_s7, %s2528_s3 }
  0x2b   : > { %p1878_p1 = pnand %p1876_p2, %p1849_p13 }
  0x2d   : > { %p1879_p6 = pneg %p1878_p1 }
  0x2f   : > { %p1884_p3 = pnand %p1882_p10, %p1879_p6 }
  0x31   : > { %1887 = shalt.err (!%p1884_p3)
}
  0x32   : > { %s1888_s28 = scalar_lea.vmem %s2101_s6, 4096  ;;  %p1896_p12 = scmp.lt.s32.totalorder %s2101_s6, %s2101_s6 }
  0x33   : > { %p1889_p5 = scmp.ne.s32.totalorder %s2101_s6, %s1888_s28  ;;  %p1897_p0 = scmp.lt.s32.totalorder %s1888_s28, %s1888_s28 }
  0x35   : > { %p1891_p7 = pnand %p1889_p5, %p1849_p13  ;;  %p1898_p2 = por %p1897_p0, %p1896_p12 }
  0x37   : > { %p1892_p9 = pneg %p1891_p7 }
  0x39   : > { %p1899_p1 = pnand %p1898_p2, %p1892_p9 }
  0x3b   : > { %1902 = shalt.err (!%p1899_p1)
}
  0x3c   : > { %s2009_s12 = smov 64   ;;  %s2010_s13 = smov 4  }
  0x3d   : > { %1639 = dma.hbm_to_vmem [thread:$0]  (!%p2097_p11), %s2528_s3, 4096, %s2101_s6, [#allocation6], %s2009_s12, %s2009_s12, %s2010_s13  }
  0x3e   : > { %s2159_s16 = sadd.s32 1, %s2003_s21   ;;  %s29_s23 = sadd.s32 1, %s1999_s20 }
  0x3f   : > { %s26_s17 = ssub.s32 %s2003_s21, %s2159_s16  ;;  %p36_p6 = scmp.ne.s32.totalorder %s1999_s20, %s1995_s19 }
  0x40   : > { %p27_p13 = scmp.eq.s32.totalorder %s26_s17, 0  ;;  %p37_p10 = scmp.eq.s32.totalorder %s2003_s21, 0 }
  0x41   : > { %p2538_p5 = scmp.eq.s32.totalorder %s2067_s22, 1  ;;  %p1650_p9 = scmp.lt.s32.totalorder %s2003_s21, 2 }
  0x42   : > { %s2168_s27 = scalar_select %p27_p13, %s1999_s20, %s29_s23  }
  0x43   : > { %p38_p3 = por %p37_p10, %p36_p6  ;;  %p2172_p7 = por %p2538_p5, %p36_p6 }
  0x44   : > { %s208_s30 = sand.u32 1, %s1999_s20   ;;  %s1508_s6 = sshll.u32 %s2003_s21, 9 }
  0x45   : > { %s2539_s29 = scalar_select %p2172_p7, 1, 0 }
  0x46   : > { %s1419_s7 = sshll.u32 %s208_s30, 5  ;;  %s2182_s10 = scalar_lea.hbm %s2525_s0, %s1508_s6 }
  0x47   : > { %s212_s11 = scalar_lea.vmem [#allocation2], %s1419_s7  ;;  %p2186_p11 = pnand %p1650_p9, %p38_p3 }
  0x48   : > { %s219_s28 = sshll.u32 %s212_s11, 4  ;;  %s2190_s15 = scalar_lea.sflag [#allocation3], %s208_s30  ;;  %s2184_s28 = int_to_ptr.vmem [resolvable:$true] %s219_s28 }
  0x49   : > { %s1903_s17 = scalar_lea.hbm %s2182_s10, 512  ;;  %p1905_p0 = pneg %p2186_p11 }
  0x4a   : > { %p1904_p12 = scmp.ne.s32.totalorder %s2182_s10, %s1903_s17  ;;  %s1908_s6 = scalar_lea.hbm %s2525_s0, 1024 }
  0x4b   : > { %p1909_p13 = scmp.lt.u32.totalorder %s2182_s10, %s2525_s0  ;;  %p1910_p6 = scmp.lt.u32.totalorder %s1908_s6, %s1903_s17 }
  0x4c   : > { %p1906_p2 = pnand %p1905_p0, %p1904_p12  ;;  %p1912_p3 = scmp.lt.u32.totalorder %s1903_s17, %s2182_s10 }
  0x4d   : > { %p1911_p10 = por %p1910_p6, %p1909_p13 }
  0x4e   : > { %p1907_p1 = pneg %p1906_p2 }
  0x4f   : > { %p1913_p5 = por %p1912_p3, %p1911_p10 }
  0x51   : > { %p1914_p9 = pnand %p1913_p5, %p1907_p1 }
  0x53   : > { %1917 = shalt.err (!%p1914_p9)
}
  0x54   : > { %s1918_s30 = scalar_lea.vmem %s2184_s28, 512  ;;  %s2011_s11 = smov [#allocation2]  }
  0x55   : > { %p1919_p12 = scmp.ne.s32.totalorder %s2184_s28, %s1918_s30  ;;  %s1923_s23 = sshll.u32 %s2011_s11, 4  ;;  %s1924_s23 = int_to_ptr.vmem [resolvable:$false] %s1923_s23 }
  0x56   : > { %s1925_s7 = scalar_lea.vmem %s1924_s23, 1024  ;;  %p1926_p4 = scmp.lt.s32.totalorder %s2184_s28, %s1924_s23 }
  0x57   : > { %p1921_p2 = pnand %p1919_p12, %p1905_p0  ;;  %p1927_p13 = scmp.lt.s32.totalorder %s1925_s7, %s1918_s30 }
  0x59   : > { %p1922_p7 = pneg %p1921_p2  ;;  %p1928_p6 = por %p1927_p13, %p1926_p4 }
  0x5b   : > { %p1929_p10 = pnand %p1928_p6, %p1922_p7 }
  0x5d   : > { %1932 = shalt.err (!%p1929_p10)
}
  0x5e   : > { %1643 = dma.hbm_to_vmem [thread:$0]  (!%p2186_p11), %s2182_s10, 512, %s2184_s28, %s2190_s15, %s2009_s12, %s2009_s12, %s2010_s13  }
  0x5f   : > { %231 = sbr.rel (%p2086_p8) target bundleno = 653 (0x28d), region = 40  ;;  %s2224_s17 = sand.u32 (!%p2086_p8), 1, %s1995_s19  }
  0x60   : > { %s1423_s6 = sshll.u32 (!%p2086_p8), %s2224_s17, 5  ;;  %s234_s8 = scalar_lea.sflag (!%p2086_p8), [#allocation3], %s2224_s17 }
  0x61   : > { %s2230_s14 = scalar_lea.vmem (!%p2086_p8), [#allocation2], %s1423_s6  ;;  %p2541_p4 = scmp.ne.s32.totalorder (!%p2086_p8), %s2534_s24, 0 }
  0x66   : > { %1978 = dma.done.wait (%p2541_p4), %s234_s8, 512  }
  0x67   : > { %1980 = vsyncadd (%p2541_p4), %s234_s8, 4294966784  ;;  %p2542_p7 = scmp.eq.s32.totalorder %s2067_s22, 0 }
  0x69   : > { %1982 = dma.done.wait (%p2542_p7), [#allocation6], 8192   ;;  %p2543_p8 = pmov %p2542_p7 }
  0x6a   : > { %v2012_v0 = vmov 0   ;;  %v1695_v1 = vld [vmem:[#allocation5 + $0x4] ss:$16 sps:$4 sm:$0xff]   ;;  %v1697_v2 = vld [vmem:[#allocation5 + $0xc] ss:$16 sps:$4 sm:$0xff]   ;;  %s2458_s10 = scalar_lea.vmem [#allocation8], %s1423_s6 }
  0x6b   : > { %1984 = vsyncadd (%p2543_p8), [#allocation6], 4294959104  ;;  %570 = vmatprep.mubr.bf16.mxu0 %v2012_v0  ;;  %643 = vmatprep.mubr.bf16.mxu1 %v2012_v0  ;;  %v1699_v3 = vld [vmem:[#allocation5] ss:$16 sps:$4 sm:$0xff]   ;;  %v1700_v4 = vld [vmem:[#allocation5 + $0x8] ss:$16 sps:$4 sm:$0xff]  }
  0x6c   : > { %538 = vmatprep.subr.bf16.mxu0 %v1695_v1  ;;  %611 = vmatprep.subr.bf16.mxu1 %v1697_v2  ;;  %v1701_v5 = vld [vmem:[#allocation5 + $0x24] ss:$16 sps:$4 sm:$0xff]   ;;  %v1703_v6 = vld [vmem:[#allocation5 + $0x2c] ss:$16 sps:$4 sm:$0xff]   ;;  %v1705_v7 = vld [vmem:[#allocation5 + $0x20] ss:$16 sps:$4 sm:$0xff]  }
  0x6d   : > { %539 = vmatpush1.bf16.msra.mxu0 %v1699_v3  ;;  %612 = vmatpush1.bf16.msra.mxu1 %v1700_v4  ;;  %v1706_v8 = vld [vmem:[#allocation5 + $0x28] ss:$16 sps:$4 sm:$0xff]   ;;  %v1707_v9 = vld [vmem:[#allocation5 + $0x44] ss:$16 sps:$4 sm:$0xff]   ;;  %v1709_v10 = vld [vmem:[#allocation5 + $0x4c] ss:$16 sps:$4 sm:$0xff]  }
  0x6e   : > { %540 = vmatprep.subr.bf16.mxu0 %v1701_v5  ;;  %613 = vmatprep.subr.bf16.mxu1 %v1703_v6  ;;  %v1711_v11 = vld [vmem:[#allocation5 + $0x40] ss:$16 sps:$4 sm:$0xff]   ;;  %v1712_v12 = vld [vmem:[#allocation5 + $0x48] ss:$16 sps:$4 sm:$0xff]   ;;  %v1713_v13 = vld [vmem:[#allocation5 + $0x64] ss:$16 sps:$4 sm:$0xff]   ;;  %v318_v5 = vlaneseq }
  0x6f   : > { %v1715_v14 = vld [vmem:[#allocation5 + $0x6c] ss:$16 sps:$4 sm:$0xff]   ;;  %v1717_v15 = vld [vmem:[#allocation5 + $0x60] ss:$16 sps:$4 sm:$0xff]   ;;  %v1718_v16 = vld [vmem:[#allocation5 + $0x68] ss:$16 sps:$4 sm:$0xff]  }
  0x70   : > { %v1719_v17 = vld [vmem:[#allocation5 + $0x84] ss:$16 sps:$4 sm:$0xff]   ;;  %v1721_v18 = vld [vmem:[#allocation5 + $0x8c] ss:$16 sps:$4 sm:$0xff]   ;;  %v1723_v19 = vld [vmem:[#allocation5 + $0x80] ss:$16 sps:$4 sm:$0xff]  }
  0x71   : > { %541 = vmatpush1.bf16.msra.mxu0 %v1705_v7  ;;  %614 = vmatpush1.bf16.msra.mxu1 %v1706_v8  ;;  %v1724_v20 = vld [vmem:[#allocation5 + $0x88] ss:$16 sps:$4 sm:$0xff]   ;;  %v1725_v21 = vld [vmem:[#allocation5 + $0xa4] ss:$16 sps:$4 sm:$0xff]   ;;  %v1727_v22 = vld [vmem:[#allocation5 + $0xac] ss:$16 sps:$4 sm:$0xff]  }
  0x72   : > { %542 = vmatprep.subr.bf16.mxu0 %v1707_v9  ;;  %615 = vmatprep.subr.bf16.mxu1 %v1709_v10  ;;  %v1729_v23 = vld [vmem:[#allocation5 + $0xa0] ss:$16 sps:$4 sm:$0xff]   ;;  %v1730_v24 = vld [vmem:[#allocation5 + $0xa8] ss:$16 sps:$4 sm:$0xff]   ;;  %v1731_v25 = vld [vmem:[#allocation5 + $0xc4] ss:$16 sps:$4 sm:$0xff]  }
  0x73   : > { %v1733_v26 = vld [vmem:[#allocation5 + $0xcc] ss:$16 sps:$4 sm:$0xff]   ;;  %v1735_v27 = vld [vmem:[#allocation5 + $0xc0] ss:$16 sps:$4 sm:$0xff]   ;;  %v1736_v28 = vld [vmem:[#allocation5 + $0xc8] ss:$16 sps:$4 sm:$0xff]  }
  0x74   : > { %v1737_v29 = vld [vmem:[#allocation5 + $0xe4] ss:$16 sps:$4 sm:$0xff]   ;;  %v1739_v30 = vld [vmem:[#allocation5 + $0xec] ss:$16 sps:$4 sm:$0xff]   ;;  %v1741_v31 = vld [vmem:[#allocation5 + $0xe0] ss:$16 sps:$4 sm:$0xff]  }
  0x75   : > { %543 = vmatpush1.bf16.msra.mxu0 %v1711_v11  ;;  %616 = vmatpush1.bf16.msra.mxu1 %v1712_v12  ;;  %v1742_v32 = vld [vmem:[#allocation5 + $0xe8] ss:$16 sps:$4 sm:$0xff]   ;;  %v2243_v33 = vld [vmem:[%s2230_s14] sm:$0xff]   ;;  %v2253_v43 = vld [vmem:[%s2230_s14 + $0x10] sm:$0xff]   ;;  %v319_v6 = vshrl.u32 %v318_v5, 7  ;;  %s1322_s28 = sshll.u32 %s2458_s10, 4  ;;  %s2475_s28 = int_to_ptr.vmem [resolvable:$true] %s1322_s28 }
  0x76   : > { %544 = vmatprep.subr.bf16.mxu0 %v1713_v13  ;;  %617 = vmatprep.subr.bf16.mxu1 %v1715_v14  ;;  %v1747_v34 = vld [vmem:[#allocation7 + $0x40] sm:$0xff]   ;;  %v1751_v38 = vld [vmem:[#allocation7 + $0x48] sm:$0xff]   ;;  %v2264_v44 = vld [vmem:[%s2230_s14 + $0x18] sm:$0xff]   ;;  %s1517_s15 = sshll.u32 %s2067_s22, 9  ;;  %s1309_s23 = scalar_lea.sflag [#allocation4], %s2224_s17 }
  0x77   : > { %v1749_v35 = vld [vmem:[#allocation7 + $0xc0] sm:$0xff]   ;;  %v1753_v39 = vld [vmem:[#allocation7 + $0xc8] sm:$0xff]   ;;  %v1755_v45 = vld [vmem:[#allocation7 + $0x50] sm:$0xff]   ;;  %v2271_v9 = vsub.s32 0, %v319_v6  ;;  %v328_v10 = vsub.s32 4, %v319_v6  ;;  %v324_v11 = vsub.s32 2, %v319_v6  ;;  %s2480_s11 = scalar_lea.hbm %s2530_s5, %s1517_s15 }
  0x78   : > { %v1748_v36 = vld [vmem:[#allocation7] sm:$0xff]   ;;  %v2246_v40 = vld [vmem:[%s2230_s14 + $0x8] sm:$0xff]   ;;  %v1757_v46 = vld [vmem:[#allocation7 + $0xd0] sm:$0xff]   ;;  %v332_v12 = vsub.s32 6, %v319_v6  ;;  %s1933_s7 = scalar_lea.vmem %s2475_s28, 512  ;;  %p2544_p0 = scmp.ne.s32.totalorder %s2539_s29, 0 }
  0x79   : > { %545 = vmatpush1.bf16.msra.mxu0 %v1717_v15  ;;  %618 = vmatpush1.bf16.msra.mxu1 %v1718_v16  ;;  %v1750_v37 = vld [vmem:[#allocation7 + $0x80] sm:$0xff]   ;;  %v1752_v41 = vld [vmem:[#allocation7 + $0x8] sm:$0xff]   ;;  %v1756_v47 = vld [vmem:[#allocation7 + $0x10] sm:$0xff]   ;;  %p1934_p11 = scmp.ne.s32.totalorder %s2475_s28, %s1933_s7  ;;  %s2013_s22 = smov [#allocation8]  }
  0x7a   : > { %546 = vmatprep.subr.bf16.mxu0 %v1719_v17  ;;  %619 = vmatprep.subr.bf16.mxu1 %v1721_v18  ;;  %v1754_v42 = vld [vmem:[#allocation7 + $0x88] sm:$0xff]   ;;  %v1758_v48 = vld [vmem:[#allocation7 + $0x90] sm:$0xff]   ;;  %v1759_v49 = vld [vmem:[#allocation7 + $0x58] sm:$0xff]   ;;  %s1937_s6 = sshll.u32 %s2013_s22, 4  ;;  %s1938_s6 = int_to_ptr.vmem [resolvable:$false] %s1937_s6 }
  0x7b   : > { %v1761_v50 = vld [vmem:[#allocation7 + $0xd8] sm:$0xff]   ;;  %v1763_v53 = vld [vmem:[#allocation7 + $0x60] sm:$0xff]   ;;  %v1767_v57 = vld [vmem:[#allocation7 + $0x68] sm:$0xff]   ;;  %p1935_p1 = pnand %p1934_p11, %p2544_p0  ;;  %s1939_s8 = scalar_lea.vmem %s1938_s6, 1024 }
  0x7c   : > { %v1760_v51 = vld [vmem:[#allocation7 + $0x18] sm:$0xff]   ;;  %v1765_v54 = vld [vmem:[#allocation7 + $0xe0] sm:$0xff]   ;;  %v1769_v58 = vld [vmem:[#allocation7 + $0xe8] sm:$0xff]   ;;  %p1940_p5 = scmp.lt.s32.totalorder %s2475_s28, %s1938_s6  ;;  %p1941_p9 = scmp.lt.s32.totalorder %s1939_s8, %s1933_s7 }
  0x7d   : > { %547 = vmatpush1.bf16.msra.mxu0 %v1723_v19  ;;  %620 = vmatpush1.bf16.msra.mxu1 %v1724_v20  ;;  %v1762_v52 = vld [vmem:[#allocation7 + $0x98] sm:$0xff]   ;;  %v1764_v55 = vld [vmem:[#allocation7 + $0x20] sm:$0xff]   ;;  %v1768_v59 = vld [vmem:[#allocation7 + $0x28] sm:$0xff]   ;;  %p1936_p3 = pneg %p1935_p1 }
  0x7e   : > { %548 = vmatprep.subr.bf16.mxu0 %v1725_v21  ;;  %621 = vmatprep.subr.bf16.mxu1 %v1727_v22  ;;  %v1766_v56 = vld [vmem:[#allocation7 + $0xa0] sm:$0xff]   ;;  %v1770_v60 = vld [vmem:[#allocation7 + $0xa8] sm:$0xff]   ;;  %v1771_v61 = vld [vmem:[#allocation7 + $0x70] sm:$0xff]   ;;  %p1942_p12 = por %p1941_p9, %p1940_p5 }
  0x7f   : > { %v1773_v62 = vld [vmem:[#allocation7 + $0xf0] sm:$0xff]   ;;  %v1775_v1 = vld [vmem:[#allocation7 + $0x78] sm:$0xff]   ;;  %v315_v7 = vld [vmem:[%s2527_s2] sm:$0xf] }
  0x80   : > { %v1772_v63 = vld [vmem:[#allocation7 + $0x30] sm:$0xff]   ;;  %v1777_v2 = vld [vmem:[#allocation7 + $0xf8] sm:$0xff]   ;;  %v316_v8 = vunpack.c.l.bf16 %v315_v7  ;;  %p1943_p2 = pnand %p1942_p12, %p1936_p3 }
  0x81   : > { %549 = vmatpush1.bf16.msra.mxu0 %v1729_v23  ;;  %622 = vmatpush1.bf16.msra.mxu1 %v1730_v24  ;;  %v1776_v3 = vld [vmem:[#allocation7 + $0x38] sm:$0xff]  }
  0x82   : > { %550 = vmatprep.subr.bf16.mxu0 %v1731_v25  ;;  %623 = vmatprep.subr.bf16.mxu1 %v1733_v26  ;;  %v1778_v4 = vld [vmem:[#allocation7 + $0xb8] sm:$0xff]   ;;  %v321_v13 = vrot.slane %v316_v8, %v2271_v9  ;;  %v329_v14 = vrot.slane %v316_v8, %v328_v10  ;;  %v325_v15 = vrot.slane %v316_v8, %v324_v11 }
  0x83   : > { %v333_v16 = vrot.slane %v316_v8, %v332_v12 }
  0x84   : > { %v2275_v17 = vrot.slane %v321_v13, %v2271_v9  ;;  %v2278_v18 = vrot.slane %v329_v14, %v2271_v9  ;;  %v2281_v19 = vrot.slane %v325_v15, %v2271_v9 }
  0x85   : > { %551 = vmatpush1.bf16.msra.mxu0 %v1735_v27  ;;  %624 = vmatpush1.bf16.msra.mxu1 %v1736_v28  ;;  %v2284_v20 = vrot.slane %v333_v16, %v2271_v9 }
  0x86   : > { %552 = vmatprep.subr.bf16.mxu0 %v1737_v29  ;;  %625 = vmatprep.subr.bf16.mxu1 %v1739_v30 }
  0x89   : > { %553 = vmatpush1.bf16.msra.mxu0 %v1741_v31  ;;  %626 = vmatpush1.bf16.msra.mxu1 %v1742_v32 }
  0x8a   : > { %1541 = vmatprep.subr.bf16.mxu0 %v1747_v34  ;;  %1581 = vmatprep.subr.bf16.mxu1 %v1749_v35 }
  0x8c   : > { %571 = vmatmul.mubr.bf16.vlgmr.msra.gmra.mrb[0].mxu0 %v2243_v33  ;;  %644 = vmatmul.mubr.bf16.vlgmr.msra.gmra.mrb[0].mxu1 %v2243_v33 }
  0x8d   : > { %580 = vmatprep.mubr.bf16.mxu0 %v2012_v0  ;;  %653 = vmatprep.mubr.bf16.mxu1 %v2012_v0 }
  0x8e   : > { %1542 = vmatpush3.bf16.msra.mxu0 %v1748_v36  ;;  %1582 = vmatpush3.bf16.msra.mxu1 %v1750_v37 }
  0x8f   : > { %1543 = vmatprep.subr.bf16.mxu0 %v1751_v38  ;;  %1583 = vmatprep.subr.bf16.mxu1 %v1753_v39 }
  0x92   : > { %1544 = vmatpush3.bf16.msra.mxu0 %v1752_v41  ;;  %1584 = vmatpush3.bf16.msra.mxu1 %v1754_v42 }
  0x93   : > { %1545 = vmatprep.subr.bf16.mxu0 %v1755_v45  ;;  %1585 = vmatprep.subr.bf16.mxu1 %v1757_v46 }
  0x94   : > { %581 = vmatmul.mubr.bf16.gmra.mrb[4].mxu0 %v2246_v40  ;;  %654 = vmatmul.mubr.bf16.gmra.mrb[4].mxu1 %v2246_v40 }
  0x95   : > { %590 = vmatprep.mubr.bf16.mxu0 %v2012_v0  ;;  %663 = vmatprep.mubr.bf16.mxu1 %v2012_v0 }
  0x96   : > { %1546 = vmatpush3.bf16.msra.mxu0 %v1756_v47  ;;  %1586 = vmatpush3.bf16.msra.mxu1 %v1758_v48 }
  0x97   : > { %1547 = vmatprep.subr.bf16.mxu0 %v1759_v49  ;;  %1587 = vmatprep.subr.bf16.mxu1 %v1761_v50 }
  0x9a   : > { %1548 = vmatpush3.bf16.msra.mxu0 %v1760_v51  ;;  %1588 = vmatpush3.bf16.msra.mxu1 %v1762_v52 }
  0x9b   : > { %1549 = vmatprep.subr.bf16.mxu0 %v1763_v53  ;;  %1589 = vmatprep.subr.bf16.mxu1 %v1765_v54 }
  0x9c   : > { %591 = vmatmul.mubr.bf16.gmra.mrb[8].mxu0 %v2253_v43  ;;  %664 = vmatmul.mubr.bf16.gmra.mrb[8].mxu1 %v2253_v43 }
  0x9d   : > { %600 = vmatprep.mubr.bf16.mxu0 %v2012_v0  ;;  %673 = vmatprep.mubr.bf16.mxu1 %v2012_v0  ;;  %v1774_v0 = vld [vmem:[#allocation7 + $0xb0] sm:$0xff]  }
  0x9e   : > { %1550 = vmatpush3.bf16.msra.mxu0 %v1764_v55  ;;  %1590 = vmatpush3.bf16.msra.mxu1 %v1766_v56 }
  0x9f   : > { %1551 = vmatprep.subr.bf16.mxu0 %v1767_v57  ;;  %1591 = vmatprep.subr.bf16.mxu1 %v1769_v58 }
  0xa2   : > { %1552 = vmatpush3.bf16.msra.mxu0 %v1768_v59  ;;  %1592 = vmatpush3.bf16.msra.mxu1 %v1770_v60 }
  0xa3   : > { %1553 = vmatprep.subr.bf16.mxu0 %v1771_v61  ;;  %1593 = vmatprep.subr.bf16.mxu1 %v1773_v62 }
  0xa4   : > { %601 = vmatmul.mubr.bf16.gmra.mrb[12].mxu0 %v2264_v44  ;;  %674 = vmatmul.mubr.bf16.gmra.mrb[12].mxu1 %v2264_v44 }
  0xa6   : > { %1554 = vmatpush3.bf16.msra.mxu0 %v1772_v63  ;;  %1594 = vmatpush3.bf16.msra.mxu1 %v1774_v0 }
  0xa7   : > { %1555 = vmatprep.subr.bf16.mxu0 %v1775_v1  ;;  %1595 = vmatprep.subr.bf16.mxu1 %v1777_v2 }
  0xaa   : > { %1556 = vmatpush3.bf16.msra.mxu0 %v1776_v3  ;;  %1596 = vmatpush3.bf16.msra.mxu1 %v1778_v4 }
 0x15f   : > { %v572_v21 = vpop.f32.mrb[0].mxu0  ;;  %v645_v22 = vpop.f32.mrb[0].mxu1 }
 0x160   : > { %v573_v23 = vadd.f32 %v572_v21, %v2275_v17  ;;  %v646_v24 = vadd.f32 %v645_v22, %v2278_v18  ;;  %v574_v25 = vpop.f32.mrb[1].mxu0  ;;  %v647_v26 = vpop.f32.mrb[1].mxu1 }
 0x161   : > { %v575_v27 = vadd.f32 %v574_v25, %v2281_v19  ;;  %v648_v28 = vadd.f32 %v647_v26, %v2284_v20  ;;  %v576_v29 = vpop.f32.mrb[2].mxu0  ;;  %v649_v30 = vpop.f32.mrb[2].mxu1 }
 0x162   : > { %v716_v31 = vmul.f32 0.70710677, %v573_v23  ;;  %v718_v32 = vmul.f32 0.70710677, %v646_v24  ;;  %v577_v36 = vadd.f32 %v576_v29, %v2275_v17  ;;  %v650_v37 = vadd.f32 %v649_v30, %v2278_v18  ;;  %v578_v38 = vpop.f32.mrb[3].mxu0  ;;  %v651_v39 = vpop.f32.mrb[3].mxu1 }
 0x163   : > { %v717_v34 = vmul.f32 0.70710677, %v575_v27  ;;  %v719_v35 = vmul.f32 0.70710677, %v648_v28  ;;  %v579_v41 = vadd.f32 %v578_v38, %v2281_v19  ;;  %v652_v42 = vadd.f32 %v651_v39, %v2284_v20 }
 0x164   : > { %1783 = verf.f32 %v716_v31  ;;  %v720_v45 = vmul.f32 0.70710677, %v577_v36  ;;  %v722_v46 = vmul.f32 0.70710677, %v650_v37  ;;  %v684_v63 = vmul.f32 0.5, %v573_v23 }
 0x165   : > { %1785 = verf.f32 %v718_v32  ;;  %v721_v47 = vmul.f32 0.70710677, %v579_v41  ;;  %v723_v49 = vmul.f32 0.70710677, %v652_v42  ;;  %v686_v6 = vmul.f32 0.5, %v646_v24 }
 0x166   : > { %1787 = verf.f32 %v717_v34  ;;  %v2301_v7 = vmul.f32 0.5, %v575_v27  ;;  %v2303_v8 = vmul.f32 0.5, %v648_v28  ;;  %v688_v12 = vmul.f32 0.5, %v577_v36 }
 0x167   : > { %1789 = verf.f32 %v719_v35  ;;  %v582_v48 = vpop.f32.mrb[4].mxu0  ;;  %v655_v51 = vpop.f32.mrb[4].mxu1  ;;  %v690_v21 = vmul.f32 0.5, %v650_v37  ;;  %v2305_v22 = vmul.f32 0.5, %v579_v41  ;;  %v2308_v27 = vmul.f32 0.5, %v652_v42 }
 0x168   : > { %1791 = verf.f32 %v720_v45  ;;  %v583_v50 = vadd.f32 %v582_v48, %v2275_v17  ;;  %v584_v52 = vpop.f32.mrb[5].mxu0  ;;  %v656_v53 = vadd.f32 %v655_v51, %v2278_v18  ;;  %v657_v55 = vpop.f32.mrb[5].mxu1 }
 0x169   : > { %1793 = verf.f32 %v722_v46  ;;  %v585_v54 = vadd.f32 %v584_v52, %v2281_v19  ;;  %v586_v56 = vpop.f32.mrb[6].mxu0  ;;  %v658_v58 = vadd.f32 %v657_v55, %v2284_v20  ;;  %v659_v59 = vpop.f32.mrb[6].mxu1 }
 0x16a   : > { %1795 = verf.f32 %v721_v47  ;;  %v724_v57 = vmul.f32 0.70710677, %v583_v50  ;;  %v588_v60 = vpop.f32.mrb[7].mxu0  ;;  %v726_v61 = vmul.f32 0.70710677, %v656_v53  ;;  %v661_v62 = vpop.f32.mrb[7].mxu1  ;;  %v587_v2 = vadd.f32 %v586_v56, %v2275_v17 }
 0x16b   : > { %1797 = verf.f32 %v723_v49  ;;  %v725_v0 = vmul.f32 0.70710677, %v585_v54  ;;  %v727_v1 = vmul.f32 0.70710677, %v658_v58  ;;  %v660_v3 = vadd.f32 %v659_v59, %v2278_v18 }
 0x16c   : > { %1799 = verf.f32 %v724_v57  ;;  %v589_v4 = vadd.f32 %v588_v60, %v2281_v19  ;;  %v728_v13 = vmul.f32 0.70710677, %v587_v2  ;;  %v662_v25 = vadd.f32 %v661_v62, %v2284_v20 }
 0x16d   : > { %1801 = verf.f32 %v726_v61  ;;  %v730_v23 = vmul.f32 0.70710677, %v660_v3  ;;  %v2310_v28 = vmul.f32 0.5, %v583_v50  ;;  %v2312_v35 = vmul.f32 0.5, %v656_v53 }
 0x16e   : > { %v1784_v5 = vpop.eup %1783  ;;  %1803 = verf.f32 %v725_v0  ;;  %v729_v29 = vmul.f32 0.70710677, %v589_v4  ;;  %v2314_v36 = vmul.f32 0.5, %v585_v54  ;;  %v2316_v37 = vmul.f32 0.5, %v658_v58 }
 0x16f   : > { %v1786_v10 = vpop.eup %1785  ;;  %v780_v11 = vadd.f32 1.0, %v1784_v5  ;;  %1805 = verf.f32 %v727_v1  ;;  %v592_v14 = vpop.f32.mrb[8].mxu0  ;;  %v731_v50 = vmul.f32 0.70710677, %v662_v25  ;;  %v2337_v0 = vmul.f32 0.5, %v660_v3 }
 0x170   : > { %v665_v15 = vpop.f32.mrb[8].mxu1  ;;  %v1788_v16 = vpop.eup %1787  ;;  %v782_v34 = vadd.f32 1.0, %v1786_v10  ;;  %1807 = verf.f32 %v728_v13  ;;  %v593_v51 = vadd.f32 %v592_v14, %v2275_v17  ;;  %v2339_v1 = vmul.f32 0.5, %v589_v4 }
 0x171   : > { %v594_v24 = vpop.f32.mrb[9].mxu0  ;;  %v1790_v26 = vpop.eup %1789  ;;  %v2320_v45 = vmul.f32 %v780_v11, %v684_v63  ;;  %v781_v42 = vadd.f32 1.0, %v1788_v16  ;;  %1809 = verf.f32 %v730_v23  ;;  %v666_v55 = vadd.f32 %v665_v15, %v2278_v18 }
 0x172   : > { %v667_v30 = vpop.f32.mrb[9].mxu1  ;;  %v596_v31 = vpop.f32.mrb[10].mxu0  ;;  %v783_v53 = vadd.f32 1.0, %v1790_v26  ;;  %1811 = verf.f32 %v729_v29  ;;  %v2328_v57 = vmul.f32 %v782_v34, %v686_v6  ;;  %v732_v59 = vmul.f32 0.70710677, %v593_v51 }
 0x173   : > { %v1792_v32 = vpop.eup %1791  ;;  %v669_v38 = vpop.f32.mrb[10].mxu1  ;;  %v595_v60 = vadd.f32 %v594_v24, %v2281_v19  ;;  %v2335_v63 = vmul.f32 0.5, %v587_v2  ;;  %v2343_v13 = vmul.f32 0.5, %v662_v25  ;;  %1813 = verf.f32 %v731_v50 }
 0x174   : > { %v2318_v39 = vpop.f32.mrb[11].mxu0  ;;  %v1794_v41 = vpop.eup %1793  ;;  %v784_v46 = vadd.f32 1.0, %v1792_v32  ;;  %v2346_v2 = vmul.f32 %v781_v42, %v2301_v7  ;;  %v2349_v3 = vmul.f32 %v783_v53, %v2303_v8  ;;  %1815 = verf.f32 %v732_v59 }
 0x175   : > { %v2322_v47 = vpop.f32.mrb[11].mxu1  ;;  %v1796_v48 = vpop.eup %1795  ;;  %v786_v49 = vadd.f32 1.0, %v1794_v41  ;;  %v734_v4 = vmul.f32 0.70710677, %v666_v55  ;;  %v733_v25 = vmul.f32 0.70710677, %v595_v60  ;;  %v668_v29 = vadd.f32 %v667_v30, %v2284_v20 }
 0x176   : > { %v1798_v52 = vpop.eup %1797  ;;  %v2325_v54 = vmul.f32 %v784_v46, %v688_v12  ;;  %v785_v12 = vadd.f32 1.0, %v1796_v48  ;;  %v597_v8 = vadd.f32 %v596_v31, %v2275_v17  ;;  %v670_v41 = vadd.f32 %v669_v38, %v2278_v18 }
 0x177   : > { %v1800_v56 = vpop.eup %1799  ;;  %v2330_v58 = vmul.f32 %v786_v49, %v690_v21  ;;  %v602_v5 = vpop.f32.mrb[12].mxu0  ;;  %v787_v24 = vadd.f32 1.0, %v1798_v52  ;;  %1817 = verf.f32 %v734_v4  ;;  %v2363_v49 = vmul.f32 0.5, %v593_v51 }
 0x178   : > { %v1802_v61 = vpop.eup %1801  ;;  %v844_v62 = vpack.c.bf16 %v2325_v54, %v2320_v45  ;;  %v675_v10 = vpop.f32.mrb[12].mxu1  ;;  %v788_v26 = vadd.f32 1.0, %v1800_v56  ;;  %v817_v42 = vmul.f32 %v785_v12, %v2305_v22  ;;  %v2365_v52 = vmul.f32 0.5, %v666_v55 }
 0x179   : > { %v1804_v11 = vpop.eup %1803  ;;  %v846_v6 = vpack.c.bf16 %v2330_v58, %v2328_v57  ;;  %v604_v14 = vpop.f32.mrb[13].mxu0  ;;  %v790_v7 = vadd.f32 1.0, %v1802_v61  ;;  %1819 = verf.f32 %v733_v25  ;;  %v735_v30 = vmul.f32 0.70710677, %v668_v29 }
 0x17a   : > { %v677_v15 = vpop.f32.mrb[13].mxu1  ;;  %v1806_v16 = vpop.eup %1805  ;;  %v789_v46 = vadd.f32 1.0, %v1804_v11  ;;  %v736_v53 = vmul.f32 0.70710677, %v597_v8  ;;  %v819_v59 = vmul.f32 %v787_v24, %v2308_v27  ;;  %v2369_v61 = vmul.f32 %v788_v26, %v2310_v28 }
 0x17b   : > { %v2351_v21 = vpop.f32.mrb[14].mxu0  ;;  %v2353_v23 = vpop.f32.mrb[14].mxu1  ;;  %v791_v48 = vadd.f32 1.0, %v1806_v16  ;;  %v2371_v31 = vmul.f32 0.5, %v595_v60  ;;  %v738_v38 = vmul.f32 0.70710677, %v670_v41  ;;  %v2374_v11 = vmul.f32 %v790_v7, %v2312_v35 }
 0x17c   : > { %v2356_v32 = vpop.f32.mrb[15].mxu0  ;;  %v2358_v34 = vpop.f32.mrb[15].mxu1  ;;  %1821 = verf.f32 %v735_v30  ;;  %v599_v51 = vadd.f32 %v2318_v39, %v2281_v19  ;;  %v672_v55 = vadd.f32 %v2322_v47, %v2284_v20  ;;  %v2381_v12 = vmul.f32 %v789_v46, %v2314_v36 }
 0x17d   : > { %v1808_v50 = vpop.eup %1807  ;;  %v2384_v27 = vmul.f32 %v791_v48, %v2316_v37  ;;  %1823 = verf.f32 %v736_v53  ;;  %v2387_v28 = vadd.f32 %v602_v5, %v2275_v17  ;;  %v2389_v35 = vmul.f32 0.5, %v668_v29 }
 0x17e   : > { %v1810_v56 = vpop.eup %1809  ;;  %v792_v60 = vadd.f32 1.0, %v1808_v50  ;;  %1825 = verf.f32 %v738_v38  ;;  %v737_v16 = vmul.f32 0.70710677, %v599_v51  ;;  %v704_v26 = vmul.f32 0.5, %v597_v8 }
 0x17f   : > { %v1812_v22 = vpop.eup %1811  ;;  %v794_v39 = vadd.f32 1.0, %v1810_v56  ;;  %v739_v47 = vmul.f32 0.70710677, %v672_v55  ;;  %v740_v36 = vmul.f32 0.70710677, %v2387_v28  ;;  %v2393_v37 = vadd.f32 %v675_v10, %v2278_v18 }
 0x180   : > { %v1814_v4 = vpop.eup %1813  ;;  %v793_v24 = vadd.f32 1.0, %v1812_v22  ;;  %1827 = verf.f32 %v737_v16  ;;  %v2396_v5 = vadd.f32 %v604_v14, %v2281_v19  ;;  %v2399_v29 = vadd.f32 %v677_v15, %v2284_v20 }
 0x181   : > { %v1816_v25 = vpop.eup %1815  ;;  %1829 = verf.f32 %v739_v47  ;;  %v845_v7 = vpack.c.bf16 %v817_v42, %v2346_v2  ;;  %v847_v46 = vpack.c.bf16 %v819_v59, %v2349_v3  ;;  %v824_v48 = vmul.f32 %v792_v60, %v2335_v63 }
 0x182   : > { %v1818_v8 = vpop.eup %1817  ;;  %v795_v50 = vadd.f32 1.0, %v1814_v4  ;;  %v706_v30 = vmul.f32 0.5, %v670_v41  ;;  %v742_v53 = vmul.f32 0.70710677, %v2393_v37  ;;  %v826_v10 = vmul.f32 %v794_v39, %v2337_v0 }
 0x183   : > { %v825_v14 = vmul.f32 %v793_v24, %v2339_v1  ;;  %v796_v56 = vadd.f32 1.0, %v1816_v25  ;;  %v741_v38 = vmul.f32 0.70710677, %v2396_v5  ;;  %1154 = vmatprep.mubr.bf16.mxu0 %v845_v7  ;;  %1219 = vmatprep.mubr.bf16.mxu1 %v847_v46  ;;  %v1820_v15 = vpop.eup %1819  ;;  %v705_v2 = vmul.f32 0.5, %v599_v51 }
 0x184   : > { %1831 = verf.f32 %v740_v36  ;;  %v743_v3 = vmul.f32 0.70710677, %v2399_v29  ;;  %v2411_v63 = vadd.f32 %v2351_v21, %v2275_v17  ;;  %1155 = vmatmul.mubr.bf16.vlgmr.msra.gmra.mrb[16].mxu0 %v844_v62  ;;  %1220 = vmatmul.mubr.bf16.vlgmr.msra.gmra.mrb[16].mxu1 %v846_v6  ;;  %v798_v0 = vadd.f32 1.0, %v1818_v8 }
 0x185   : > { %1833 = verf.f32 %v742_v53  ;;  %v680_v1 = vadd.f32 %v2353_v23, %v2278_v18  ;;  %v2423_v41 = vadd.f32 %v2356_v32, %v2281_v19  ;;  %v827_v17 = vmul.f32 %v795_v50, %v2343_v13 }
 0x186   : > { %v1822_v42 = vpop.eup %1821  ;;  %v707_v21 = vmul.f32 0.5, %v672_v55  ;;  %1835 = verf.f32 %v741_v38  ;;  %v744_v45 = vmul.f32 0.70710677, %v2411_v63  ;;  %v828_v57 = vmul.f32 %v796_v56, %v2363_v49 }
 0x187   : > { %v1824_v54 = vpop.eup %1823  ;;  %v797_v58 = vadd.f32 1.0, %v1820_v15  ;;  %1837 = verf.f32 %v743_v3  ;;  %v746_v62 = vmul.f32 0.70710677, %v680_v1  ;;  %v745_v18 = vmul.f32 0.70710677, %v2423_v41 }
 0x188   : > { %v1826_v6 = vpop.eup %1825  ;;  %v800_v59 = vadd.f32 1.0, %v1824_v54  ;;  %1839 = verf.f32 %v744_v45  ;;  %v682_v19 = vadd.f32 %v2358_v34, %v2284_v20  ;;  %v830_v13 = vmul.f32 %v798_v0, %v2365_v52 }
 0x189   : > { %v802_v23 = vadd.f32 1.0, %v1826_v6  ;;  %1841 = verf.f32 %v746_v62  ;;  %v849_v32 = vpack.c.bf16 %v825_v14, %v2381_v12  ;;  %v799_v51 = vadd.f32 1.0, %v1822_v42 }
 0x18a   : > { %v1828_v22 = vpop.eup %1827  ;;  %v832_v49 = vmul.f32 %v800_v59, %v704_v26  ;;  %1843 = verf.f32 %v745_v18  ;;  %v747_v55 = vmul.f32 0.70710677, %v682_v19  ;;  %v851_v39 = vpack.c.bf16 %v827_v17, %v2384_v27 }
 0x18b   : > { %v1830_v60 = vpop.eup %1829  ;;  %v834_v16 = vmul.f32 %v802_v23, %v706_v30  ;;  %v801_v4 = vadd.f32 1.0, %v1828_v22  ;;  %1162 = vmatprep.mubr.bf16.mxu0 %v849_v32  ;;  %v848_v24 = vpack.c.bf16 %v824_v48, %v2369_v61  ;;  %v850_v34 = vpack.c.bf16 %v826_v10, %v2374_v11 }
 0x18c   : > { %v803_v20 = vadd.f32 1.0, %v1830_v60  ;;  %1845 = verf.f32 %v747_v55  ;;  %v852_v52 = vpack.c.bf16 %v832_v49, %v828_v57  ;;  %v829_v12 = vmul.f32 %v797_v58, %v2371_v31  ;;  %1227 = vmatprep.mubr.bf16.mxu1 %v851_v39 }
 0x18d   : > { %v833_v47 = vmul.f32 %v801_v4, %v705_v2  ;;  %1163 = vmatmul.mubr.bf16.gmra.mrb[20].mxu0 %v848_v24  ;;  %v854_v26 = vpack.c.bf16 %v834_v16, %v830_v13  ;;  %v831_v36 = vmul.f32 %v799_v51, %v2389_v35  ;;  %1228 = vmatmul.mubr.bf16.gmra.mrb[20].mxu1 %v850_v34  ;;  %v708_v30 = vmul.f32 0.5, %v2387_v28 }
 0x18e   : > { %v1832_v25 = vpop.eup %1831  ;;  %v835_v7 = vmul.f32 %v803_v20, %v707_v21  ;;  %v710_v10 = vmul.f32 0.5, %v2393_v37  ;;  %v712_v35 = vmul.f32 0.5, %v2411_v63  ;;  %v709_v15 = vmul.f32 0.5, %v2396_v5 }
 0x18f   : > { %v1834_v46 = vpop.eup %1833  ;;  %v853_v27 = vpack.c.bf16 %v833_v47, %v829_v12  ;;  %v804_v50 = vadd.f32 1.0, %v1832_v25  ;;  %v714_v2 = vmul.f32 0.5, %v680_v1  ;;  %v713_v0 = vmul.f32 0.5, %v2423_v41 }
 0x190   : > { %v1836_v8 = vpop.eup %1835  ;;  %v855_v61 = vpack.c.bf16 %v835_v7, %v831_v36  ;;  %v806_v31 = vadd.f32 1.0, %v1834_v46  ;;  %v711_v37 = vmul.f32 0.5, %v2399_v29  ;;  %v715_v58 = vmul.f32 0.5, %v682_v19  ;;  %v924_v29 = vld [vmem:[%s2529_s4] sm:$0x1] }
 0x191   : > { %v1838_v48 = vpop.eup %1837  ;;  %1170 = vmatprep.mubr.bf16.mxu0 %v853_v27  ;;  %v805_v14 = vadd.f32 1.0, %v1836_v8  ;;  %v836_v42 = vmul.f32 %v804_v50, %v708_v30  ;;  %v925_v23 = vunpack.c.l.bf16 %v924_v29  ;;  %v1252_v20 = vunpack.c.l.bf16 %v2243_v33 }
 0x192   : > { %v1840_v11 = vpop.eup %1839  ;;  %1235 = vmatprep.mubr.bf16.mxu1 %v855_v61  ;;  %v807_v17 = vadd.f32 1.0, %v1838_v48  ;;  %v838_v54 = vmul.f32 %v806_v31, %v710_v10  ;;  %v1253_v47 = vunpack.c.h.bf16 %v2243_v33  ;;  %v1254_v10 = vunpack.c.l.bf16 %v2246_v40 }
 0x193   : > { %v1842_v53 = vpop.eup %1841  ;;  %v808_v56 = vadd.f32 1.0, %v1840_v11  ;;  %v837_v63 = vmul.f32 %v805_v14, %v709_v15  ;;  %v2448_v22 = vrot.slane %v925_v23, %v2271_v9 }
 0x194   : > { %v1844_v38 = vpop.eup %1843  ;;  %v810_v3 = vadd.f32 1.0, %v1842_v53  ;;  %v839_v59 = vmul.f32 %v807_v17, %v711_v37 }
 0x195   : > { %v840_v21 = vmul.f32 %v808_v56, %v712_v35  ;;  %v809_v28 = vadd.f32 1.0, %v1844_v38  ;;  %1171 = vmatmul.mubr.bf16.gmra.mrb[24].mxu0 %v852_v52  ;;  %1236 = vmatmul.mubr.bf16.gmra.mrb[24].mxu1 %v854_v26  ;;  %v1255_v38 = vunpack.c.h.bf16 %v2246_v40 }
 0x196   : > { %v1846_v45 = vpop.eup %1845  ;;  %v842_v57 = vmul.f32 %v810_v3, %v714_v2 }
 0x197   : > { %v841_v62 = vmul.f32 %v809_v28, %v713_v0  ;;  %v811_v6 = vadd.f32 1.0, %v1846_v45  ;;  %v856_v5 = vpack.c.bf16 %v840_v21, %v836_v42 }
 0x198   : > { %v858_v1 = vpack.c.bf16 %v842_v57, %v838_v54 }
 0x199   : > { %v843_v18 = vmul.f32 %v811_v6, %v715_v58  ;;  %v857_v41 = vpack.c.bf16 %v841_v62, %v837_v63  ;;  %v1256_v62 = vunpack.c.l.bf16 %v2253_v43 }
 0x19b   : > { %1178 = vmatprep.mubr.bf16.mxu0 %v857_v41  ;;  %v859_v13 = vpack.c.bf16 %v843_v18, %v839_v59  ;;  %v1257_v18 = vunpack.c.h.bf16 %v2253_v43  ;;  %v1258_v43 = vunpack.c.l.bf16 %v2264_v44 }
 0x19d   : > { %1243 = vmatprep.mubr.bf16.mxu1 %v859_v13  ;;  %1179 = vmatmul.mubr.bf16.gmra.mrb[28].mxu0 %v856_v5 }
 0x19e   : > { %1244 = vmatmul.mubr.bf16.gmra.mrb[28].mxu1 %v858_v1 }
 0x257   : > { %v1557_v19 = vpop.f32.mrb[16].mxu0  ;;  %v1597_v32 = vpop.f32.mrb[16].mxu1 }
 0x258   : > { %v1558_v51 = vpop.f32.mrb[17].mxu0  ;;  %v1598_v49 = vpop.f32.mrb[17].mxu1 }
 0x259   : > { %v1559_v55 = vadd.f32 %v1558_v51, %v1557_v19  ;;  %v1599_v60 = vadd.f32 %v1598_v49, %v1597_v32  ;;  %v1560_v16 = vpop.f32.mrb[18].mxu0  ;;  %v1600_v4 = vpop.f32.mrb[18].mxu1 }
 0x25a   : > { %v1561_v39 = vpop.f32.mrb[19].mxu0  ;;  %v1601_v24 = vpop.f32.mrb[19].mxu1 }
 0x25b   : > { %v1157_v34 = vadd.f32 %v1559_v55, %v2448_v22  ;;  %v1562_v52 = vadd.f32 %v1561_v39, %v1560_v16  ;;  %v1602_v12 = vadd.f32 %v1601_v24, %v1600_v4 }
 0x25d   : > { %v1222_v26 = vadd.f32 %v1599_v60, %v1157_v34  ;;  %v1160_v9 = vadd.f32 %v1562_v52, %v2448_v22 }
 0x25f   : > { %v1260_v25 = vadd.f32 %v1252_v20, %v1222_v26  ;;  %v1225_v36 = vadd.f32 %v1602_v12, %v1160_v9  ;;  %v1259_v26 = vunpack.c.h.bf16 %v2264_v44 }
 0x260   : > { %v1563_v7 = vpop.f32.mrb[20].mxu0  ;;  %v1603_v27 = vpop.f32.mrb[20].mxu1 }
 0x261   : > { %v1261_v46 = vadd.f32 %v1253_v47, %v1225_v36  ;;  %v1564_v8 = vpop.f32.mrb[21].mxu0  ;;  %v1604_v48 = vpop.f32.mrb[21].mxu1 }
 0x262   : > { %v1565_v61 = vadd.f32 %v1564_v8, %v1563_v7  ;;  %v1566_v50 = vpop.f32.mrb[22].mxu0  ;;  %v1605_v30 = vadd.f32 %v1604_v48, %v1603_v27  ;;  %v1606_v31 = vpop.f32.mrb[22].mxu1 }
 0x263   : > { %v1521_v11 = vpack.c.bf16 %v1261_v46, %v1260_v25  ;;  %v1567_v53 = vpop.f32.mrb[23].mxu0  ;;  %v1607_v35 = vpop.f32.mrb[23].mxu1 }
 0x264   : > { %v1165_v33 = vadd.f32 %v1565_v61, %v2448_v22  ;;  %v1568_v14 = vadd.f32 %v1567_v53, %v1566_v50  ;;  %v1608_v56 = vadd.f32 %v1607_v35, %v1606_v31 }
 0x265   : > { %1522 = vst [vmem:[%s2458_s10] sm:$0xff] %v1521_v11  }
 0x266   : > { %v1230_v15 = vadd.f32 %v1605_v30, %v1165_v33  ;;  %v1168_v2 = vadd.f32 %v1568_v14, %v2448_v22 }
 0x268   : > { %v1262_v3 = vadd.f32 %v1254_v10, %v1230_v15  ;;  %v1233_v0 = vadd.f32 %v1608_v56, %v1168_v2  ;;  %v1569_v42 = vpop.f32.mrb[24].mxu0  ;;  %v1609_v17 = vpop.f32.mrb[24].mxu1 }
 0x269   : > { %v1570_v21 = vpop.f32.mrb[25].mxu0  ;;  %v1610_v54 = vpop.f32.mrb[25].mxu1 }
 0x26a   : > { %v1263_v28 = vadd.f32 %v1255_v38, %v1233_v0  ;;  %v1571_v45 = vadd.f32 %v1570_v21, %v1569_v42  ;;  %v1572_v37 = vpop.f32.mrb[26].mxu0  ;;  %v1611_v57 = vadd.f32 %v1610_v54, %v1609_v17  ;;  %v1612_v58 = vpop.f32.mrb[26].mxu1 }
 0x26b   : > { %v1573_v63 = vpop.f32.mrb[27].mxu0  ;;  %v1613_v1 = vpop.f32.mrb[27].mxu1 }
 0x26c   : > { %v1526_v6 = vpack.c.bf16 %v1263_v28, %v1262_v3  ;;  %v1173_v40 = vadd.f32 %v1571_v45, %v2448_v22  ;;  %v1574_v5 = vadd.f32 %v1573_v63, %v1572_v37  ;;  %v1614_v59 = vadd.f32 %v1613_v1, %v1612_v58 }
 0x26e   : > { %1538 = vst [vmem:[%s2458_s10 + $0x8] sm:$0xff] %v1526_v6   ;;  %v1238_v41 = vadd.f32 %v1611_v57, %v1173_v40  ;;  %v1176_v13 = vadd.f32 %v1574_v5, %v2448_v22 }
 0x270   : > { %v1264_v29 = vadd.f32 %v1256_v62, %v1238_v41  ;;  %v1241_v23 = vadd.f32 %v1614_v59, %v1176_v13  ;;  %v1575_v19 = vpop.f32.mrb[28].mxu0 }
 0x271   : > { %v1615_v32 = vpop.f32.mrb[28].mxu1  ;;  %v1576_v51 = vpop.f32.mrb[29].mxu0 }
 0x272   : > { %v1265_v49 = vadd.f32 %v1257_v18, %v1241_v23  ;;  %v1577_v55 = vadd.f32 %v1576_v51, %v1575_v19  ;;  %v1616_v60 = vpop.f32.mrb[29].mxu1  ;;  %v1578_v16 = vpop.f32.mrb[30].mxu0 }
 0x273   : > { %v1617_v4 = vadd.f32 %v1616_v60, %v1615_v32  ;;  %v1618_v39 = vpop.f32.mrb[30].mxu1  ;;  %v1579_v24 = vpop.f32.mrb[31].mxu0 }
 0x274   : > { %v1531_v20 = vpack.c.bf16 %v1265_v49, %v1264_v29  ;;  %v1181_v34 = vadd.f32 %v1577_v55, %v2448_v22  ;;  %v1580_v52 = vadd.f32 %v1579_v24, %v1578_v16  ;;  %v1619_v12 = vpop.f32.mrb[31].mxu1 }
 0x275   : > { %v1620_v47 = vadd.f32 %v1619_v12, %v1618_v39 }
 0x276   : > { %1539 = vst [vmem:[%s2458_s10 + $0x10] sm:$0xff] %v1531_v20   ;;  %v1246_v9 = vadd.f32 %v1617_v4, %v1181_v34  ;;  %v1184_v25 = vadd.f32 %v1580_v52, %v2448_v22 }
 0x278   : > { %v1266_v36 = vadd.f32 %v1258_v43, %v1246_v9  ;;  %v1249_v7 = vadd.f32 %v1620_v47, %v1184_v25 }
 0x27a   : > { %v1267_v46 = vadd.f32 %v1259_v26, %v1249_v7 }
 0x27c   : > { %v1536_v44 = vpack.c.bf16 %v1267_v46, %v1266_v36 }
 0x27e   : > { %1540 = vst [vmem:[%s2458_s10 + $0x18] sm:$0xff] %v1536_v44  }
 0x27f   : > { %1946 = shalt.err (!%p1943_p2)
}
 0x280   : > { %s1947_s14 = scalar_lea.hbm %s2480_s11, 512  ;;  %s1951_s12 = scalar_lea.hbm %s2530_s5, 1024 }
 0x281   : > { %p1948_p13 = scmp.ne.s32.totalorder %s2480_s11, %s1947_s14  ;;  %p1952_p4 = scmp.lt.u32.totalorder %s2480_s11, %s2530_s5 }
 0x282   : > { %p1953_p7 = scmp.lt.u32.totalorder %s1951_s12, %s1947_s14  ;;  %p1955_p11 = scmp.lt.u32.totalorder %s1947_s14, %s2480_s11 }
 0x283   : > { %p1949_p6 = pnand %p1948_p13, %p2544_p0 }
 0x284   : > { %p1954_p8 = por %p1953_p7, %p1952_p4 }
 0x285   : > { %p1950_p10 = pneg %p1949_p6 }
 0x286   : > { %p1956_p1 = por %p1955_p11, %p1954_p8 }
 0x288   : > { %p1957_p3 = pnand %p1956_p1, %p1950_p10 }
 0x28a   : > { %1960 = shalt.err (!%p1957_p3)
}
 0x28b   : > { %s2014_s15 = smov 64   ;;  %s2015_s9 = smov 4  }
 0x28c   : > { %1631 = dma.vmem_to_hbm [thread:$0]  (%p2544_p0), %s2475_s28, 512, %s2480_s11, %s1309_s23, %s2014_s15, %s2014_s15, %s2015_s9  }
 0x28d PF: > { %s1337_s30 = sand.u32 1, %s1991_s18   ;;  %p2545_p5 = scmp.ne.s32.totalorder %s2535_s25, 0 }
 0x28e   : > { %p2546_p9 = scmp.ge.s32.totalorder %s2003_s21, 2  ;;  %s1338_s7 = scalar_lea.sflag [#allocation4], %s1337_s30 }
 0x290   : > { %p1645_p12 = pnand %p2546_p9, %p2545_p5 }
 0x292   : > { %1986 = dma.done.wait (!%p1645_p12), %s1338_s7, 512  }
 0x293   : > { %1988 = vsyncadd (!%p1645_p12), %s1338_s7, 4294966784  ;;  %p19_p2 = scmp.ge.s32.totalorder %s2159_s16, 4   ;;  %s2547_s18 = smov %s1995_s19 }
 0x294   : > { %s2548_s19 = smov %s1999_s20  ;;  %s2549_s20 = smov %s2168_s27 }
 0x295   : > { %s2550_s21 = smov %s2159_s16  ;;  %21 = sbr.rel (!%p19_p2) target bundleno = 6 (0x6), region = 93 }
 0x29c   :  { %1343 = vsyncpa [#allocation3], 1 }
 0x29d   :  { %1345 = vsyncpa [#allocation3 + $0x1], 1 }
 0x29e   :  { %1346 = vsyncpa [#allocation6], 1 }
 0x29f   :  { %1347 = vsyncpa [#allocation4], 1 }
 0x2a0   :  { %1349 = vsyncpa [#allocation4 + $0x1], 1 }

// kernel: _ffn_pallas.1
= control target key start
LH: loop header
LB: loop body
LE: loop exit
PB: predicated region body
PF: predicated region fallthrough
CT: control target
= control target key end

     0   :  { %10 = vsyncpa [#allocation3], 0  ;;  %s2525_s0 = inlined_call_operand.hbm [shape: bf16[128,128], index: 0, kind: input, shape index: {}]   ;;  %s2526_s1 = inlined_call_operand.hbm [shape: bf16[128,512], index: 1, kind: input, shape index: {}]   ;;  %s2527_s2 = inlined_call_operand.vmem [shape: bf16[1,512], index: 2, kind: input, shape index: {}]   ;;  %s2528_s3 = inlined_call_operand.hbm [shape: bf16[512,128], index: 3, kind: input, shape index: {}]   ;;  %s2529_s4 = inlined_call_operand.vmem [shape: bf16[1,128], index: 4, kind: input, shape index: {}]   ;;  %s2530_s5 = inlined_call_operand.hbm [shape: bf16[128,128], index: 5, kind: output, shape index: {}]  }
   0x1   :  { %12 = vsyncpa [#allocation3 + $0x1], 0 }
   0x2   :  { %13 = vsyncpa [#allocation6], 0 }
   0x3   :  { %14 = vsyncpa [#allocation4], 0 }
   0x4   :  { %16 = vsyncpa [#allocation4 + $0x1], 0  ;;  %s2046_s18 = smov 0   ;;  %s2048_s19 = smov 0  }
   0x5   :  { %s2050_s20 = smov 0   ;;  %s2052_s21 = smov 0  }
   0x6 LB: > { %s2067_s22 = sadd.s32 4294967295, %s2003_s21   ;;  %s1414_s23 = sadd.s32 4294967294, %s2003_s21   ;;  %s2003_s21 = sphi %s2052_s21, %s2550_s21   ;;  %s1999_s20 = sphi %s2050_s20, %s2549_s20   ;;  %s1995_s19 = sphi %s2048_s19, %s2548_s19   ;;  %s1991_s18 = sphi %s2046_s18, %s2547_s18  }
   0x7   : > { %p42_p0 = scmp.ne.s32.totalorder %s1995_s19, %s1991_s18  ;;  %p2531_p1 = scmp.eq.s32.totalorder %s2067_s22, 0 }
   0x8   : > { %p156_p3 = scmp.eq.s32.totalorder %s1414_s23, 1  ;;  %p1415_p5 = scmp.ge.s32.totalorder %s2003_s21, 1 }
   0x9   : > { %p2076_p4 = por %p2531_p1, %p42_p0  ;;  %p163_p7 = scmp.lt.s32.totalorder %s2003_s21, 3 }
   0xa   : > { %p2081_p6 = por %p156_p3, %p42_p0  ;;  %s2005_s27 = smov [#allocation5]  }
   0xb   : > { %s2534_s24 = scalar_select %p2076_p4, 1, 0 }
   0xc   : > { %s2535_s25 = scalar_select %p2081_p6, 1, 0 }
   0xd   : > { %p2086_p8 = pnand %p1415_p5, %p163_p7  ;;  %s175_s28 = sshll.u32 %s2005_s27, 4  ;;  %s2090_s28 = int_to_ptr.vmem [resolvable:$true] %s175_s28 }
   0xe   : > { %s2006_s30 = smov [#allocation7]   ;;  %s1847_s9 = scalar_lea.hbm %s2526_s1, 4096 }
   0xf   : > { %p1633_p9 = pneg %p2086_p8  ;;  %s191_s6 = sshll.u32 %s2006_s30, 4  ;;  %s2101_s6 = int_to_ptr.vmem [resolvable:$true] %s191_s6 }
  0x10   : > { %p1848_p12 = scmp.ne.s32.totalorder %s2526_s1, %s1847_s9  ;;  %p1854_p5 = scmp.lt.u32.totalorder %s1847_s9, %s2526_s1 }
  0x11   : > { %p2097_p11 = pnand %p1633_p9, %p2531_p1 }
  0x13   : > { %p1849_p13 = pneg %p2097_p11 }
  0x15   : > { %p1850_p0 = pnand %p1849_p13, %p1848_p12 }
  0x17   : > { %p1851_p3 = pneg %p1850_p0 }
  0x19   : > { %p1856_p7 = pnand %p1854_p5, %p1851_p3 }
  0x1b   : > { %1859 = shalt.err (!%p1856_p7)
}
  0x1c   : > { %s1860_s14 = scalar_lea.vmem %s2090_s28, 4096  ;;  %p1868_p2 = scmp.lt.s32.totalorder %s2090_s28, %s2090_s28 }
  0x1d   : > { %p1861_p9 = scmp.ne.s32.totalorder %s2090_s28, %s1860_s14  ;;  %p1869_p12 = scmp.lt.s32.totalorder %s1860_s14, %s1860_s14 }
  0x1f   : > { %p1863_p10 = pnand %p1861_p9, %p1849_p13  ;;  %p1870_p0 = por %p1869_p12, %p1868_p2 }
  0x21   : > { %p1864_p1 = pneg %p1863_p10 }
  0x23   : > { %p1871_p6 = pnand %p1870_p0, %p1864_p1 }
  0x25   : > { %1874 = shalt.err (!%p1871_p6)
}
  0x26   : > { %s2007_s15 = smov 256   ;;  %s2008_s16 = smov 16  }
  0x27   : > { %1636 = dma.hbm_to_vmem [thread:$0]  (!%p2097_p11), %s2526_s1, 4096, %s2090_s28, [#allocation6], %s2007_s15, %s2007_s15, %s2008_s16  }
  0x28   : > { %s1875_s7 = scalar_lea.hbm %s2528_s3, 4096 }
  0x29   : > { %p1876_p2 = scmp.ne.s32.totalorder %s2528_s3, %s1875_s7  ;;  %p1882_p10 = scmp.lt.u32.totalorder %s1875_s7, %s2528_s3 }
  0x2b   : > { %p1878_p1 = pnand %p1876_p2, %p1849_p13 }
  0x2d   : > { %p1879_p6 = pneg %p1878_p1 }
  0x2f   : > { %p1884_p3 = pnand %p1882_p10, %p1879_p6 }
  0x31   : > { %1887 = shalt.err (!%p1884_p3)
}
  0x32   : > { %s1888_s28 = scalar_lea.vmem %s2101_s6, 4096  ;;  %p1896_p12 = scmp.lt.s32.totalorder %s2101_s6, %s2101_s6 }
  0x33   : > { %p1889_p5 = scmp.ne.s32.totalorder %s2101_s6, %s1888_s28  ;;  %p1897_p0 = scmp.lt.s32.totalorder %s1888_s28, %s1888_s28 }
  0x35   : > { %p1891_p7 = pnand %p1889_p5, %p1849_p13  ;;  %p1898_p2 = por %p1897_p0, %p1896_p12 }
  0x37   : > { %p1892_p9 = pneg %p1891_p7 }
  0x39   : > { %p1899_p1 = pnand %p1898_p2, %p1892_p9 }
  0x3b   : > { %1902 = shalt.err (!%p1899_p1)
}
  0x3c   : > { %s2009_s12 = smov 64   ;;  %s2010_s13 = smov 4  }
  0x3d   : > { %1639 = dma.hbm_to_vmem [thread:$0]  (!%p2097_p11), %s2528_s3, 4096, %s2101_s6, [#allocation6], %s2009_s12, %s2009_s12, %s2010_s13  }
  0x3e   : > { %s2159_s16 = sadd.s32 1, %s2003_s21   ;;  %s29_s23 = sadd.s32 1, %s1999_s20 }
  0x3f   : > { %s26_s17 = ssub.s32 %s2003_s21, %s2159_s16  ;;  %p36_p6 = scmp.ne.s32.totalorder %s1999_s20, %s1995_s19 }
  0x40   : > { %p27_p13 = scmp.eq.s32.totalorder %s26_s17, 0  ;;  %p37_p10 = scmp.eq.s32.totalorder %s2003_s21, 0 }
  0x41   : > { %p2538_p5 = scmp.eq.s32.totalorder %s2067_s22, 1  ;;  %p1650_p9 = scmp.lt.s32.totalorder %s2003_s21, 2 }
  0x42   : > { %s2168_s27 = scalar_select %p27_p13, %s1999_s20, %s29_s23  }
  0x43   : > { %p38_p3 = por %p37_p10, %p36_p6  ;;  %p2172_p7 = por %p2538_p5, %p36_p6 }
  0x44   : > { %s208_s30 = sand.u32 1, %s1999_s20   ;;  %s1508_s6 = sshll.u32 %s2003_s21, 9 }
  0x45   : > { %s2539_s29 = scalar_select %p2172_p7, 1, 0 }
  0x46   : > { %s1419_s7 = sshll.u32 %s208_s30, 5  ;;  %s2182_s10 = scalar_lea.hbm %s2525_s0, %s1508_s6 }
  0x47   : > { %s212_s11 = scalar_lea.vmem [#allocation2], %s1419_s7  ;;  %p2186_p11 = pnand %p1650_p9, %p38_p3 }
  0x48   : > { %s219_s28 = sshll.u32 %s212_s11, 4  ;;  %s2190_s15 = scalar_lea.sflag [#allocation3], %s208_s30  ;;  %s2184_s28 = int_to_ptr.vmem [resolvable:$true] %s219_s28 }
  0x49   : > { %s1903_s17 = scalar_lea.hbm %s2182_s10, 512  ;;  %p1905_p0 = pneg %p2186_p11 }
  0x4a   : > { %p1904_p12 = scmp.ne.s32.totalorder %s2182_s10, %s1903_s17  ;;  %s1908_s6 = scalar_lea.hbm %s2525_s0, 1024 }
  0x4b   : > { %p1909_p13 = scmp.lt.u32.totalorder %s2182_s10, %s2525_s0  ;;  %p1910_p6 = scmp.lt.u32.totalorder %s1908_s6, %s1903_s17 }
  0x4c   : > { %p1906_p2 = pnand %p1905_p0, %p1904_p12  ;;  %p1912_p3 = scmp.lt.u32.totalorder %s1903_s17, %s2182_s10 }
  0x4d   : > { %p1911_p10 = por %p1910_p6, %p1909_p13 }
  0x4e   : > { %p1907_p1 = pneg %p1906_p2 }
  0x4f   : > { %p1913_p5 = por %p1912_p3, %p1911_p10 }
  0x51   : > { %p1914_p9 = pnand %p1913_p5, %p1907_p1 }
  0x53   : > { %1917 = shalt.err (!%p1914_p9)
}
  0x54   : > { %s1918_s30 = scalar_lea.vmem %s2184_s28, 512  ;;  %s2011_s11 = smov [#allocation2]  }
  0x55   : > { %p1919_p12 = scmp.ne.s32.totalorder %s2184_s28, %s1918_s30  ;;  %s1923_s23 = sshll.u32 %s2011_s11, 4  ;;  %s1924_s23 = int_to_ptr.vmem [resolvable:$false] %s1923_s23 }
  0x56   : > { %s1925_s7 = scalar_lea.vmem %s1924_s23, 1024  ;;  %p1926_p4 = scmp.lt.s32.totalorder %s2184_s28, %s1924_s23 }
  0x57   : > { %p1921_p2 = pnand %p1919_p12, %p1905_p0  ;;  %p1927_p13 = scmp.lt.s32.totalorder %s1925_s7, %s1918_s30 }
  0x59   : > { %p1922_p7 = pneg %p1921_p2  ;;  %p1928_p6 = por %p1927_p13, %p1926_p4 }
  0x5b   : > { %p1929_p10 = pnand %p1928_p6, %p1922_p7 }
  0x5d   : > { %1932 = shalt.err (!%p1929_p10)
}
  0x5e   : > { %1643 = dma.hbm_to_vmem [thread:$0]  (!%p2186_p11), %s2182_s10, 512, %s2184_s28, %s2190_s15, %s2009_s12, %s2009_s12, %s2010_s13  }
  0x5f   : > { %231 = sbr.rel (%p2086_p8) target bundleno = 653 (0x28d), region = 40  ;;  %s2224_s17 = sand.u32 (!%p2086_p8), 1, %s1995_s19  }
  0x60   : > { %s1423_s6 = sshll.u32 (!%p2086_p8), %s2224_s17, 5  ;;  %s234_s8 = scalar_lea.sflag (!%p2086_p8), [#allocation3], %s2224_s17 }
  0x61   : > { %s2230_s14 = scalar_lea.vmem (!%p2086_p8), [#allocation2], %s1423_s6  ;;  %p2541_p4 = scmp.ne.s32.totalorder (!%p2086_p8), %s2534_s24, 0 }
  0x66   : > { %1978 = dma.done.wait (%p2541_p4), %s234_s8, 512  }
  0x67   : > { %1980 = vsyncadd (%p2541_p4), %s234_s8, 4294966784  ;;  %p2542_p7 = scmp.eq.s32.totalorder %s2067_s22, 0 }
  0x69   : > { %1982 = dma.done.wait (%p2542_p7), [#allocation6], 8192   ;;  %p2543_p8 = pmov %p2542_p7 }
  0x6a   : > { %v2012_v0 = vmov 0   ;;  %v1695_v1 = vld [vmem:[#allocation5 + $0x4] ss:$16 sps:$4 sm:$0xff]   ;;  %v1697_v2 = vld [vmem:[#allocation5 + $0xc] ss:$16 sps:$4 sm:$0xff]   ;;  %s2458_s10 = scalar_lea.vmem [#allocation8], %s1423_s6 }
  0x6b   : > { %1984 = vsyncadd (%p2543_p8), [#allocation6], 4294959104  ;;  %570 = vmatprep.mubr.bf16.mxu0 %v2012_v0  ;;  %643 = vmatprep.mubr.bf16.mxu1 %v2012_v0  ;;  %v1699_v3 = vld [vmem:[#allocation5] ss:$16 sps:$4 sm:$0xff]   ;;  %v1700_v4 = vld [vmem:[#allocation5 + $0x8] ss:$16 sps:$4 sm:$0xff]  }
  0x6c   : > { %538 = vmatprep.subr.bf16.mxu0 %v1695_v1  ;;  %611 = vmatprep.subr.bf16.mxu1 %v1697_v2  ;;  %v1701_v5 = vld [vmem:[#allocation5 + $0x24] ss:$16 sps:$4 sm:$0xff]   ;;  %v1703_v6 = vld [vmem:[#allocation5 + $0x2c] ss:$16 sps:$4 sm:$0xff]   ;;  %v1705_v7 = vld [vmem:[#allocation5 + $0x20] ss:$16 sps:$4 sm:$0xff]  }
  0x6d   : > { %539 = vmatpush1.bf16.msra.mxu0 %v1699_v3  ;;  %612 = vmatpush1.bf16.msra.mxu1 %v1700_v4  ;;  %v1706_v8 = vld [vmem:[#allocation5 + $0x28] ss:$16 sps:$4 sm:$0xff]   ;;  %v1707_v9 = vld [vmem:[#allocation5 + $0x44] ss:$16 sps:$4 sm:$0xff]   ;;  %v1709_v10 = vld [vmem:[#allocation5 + $0x4c] ss:$16 sps:$4 sm:$0xff]  }
  0x6e   : > { %540 = vmatprep.subr.bf16.mxu0 %v1701_v5  ;;  %613 = vmatprep.subr.bf16.mxu1 %v1703_v6  ;;  %v1711_v11 = vld [vmem:[#allocation5 + $0x40] ss:$16 sps:$4 sm:$0xff]   ;;  %v1712_v12 = vld [vmem:[#allocation5 + $0x48] ss:$16 sps:$4 sm:$0xff]   ;;  %v1713_v13 = vld [vmem:[#allocation5 + $0x64] ss:$16 sps:$4 sm:$0xff]   ;;  %v318_v5 = vlaneseq }
  0x6f   : > { %v1715_v14 = vld [vmem:[#allocation5 + $0x6c] ss:$16 sps:$4 sm:$0xff]   ;;  %v1717_v15 = vld [vmem:[#allocation5 + $0x60] ss:$16 sps:$4 sm:$0xff]   ;;  %v1718_v16 = vld [vmem:[#allocation5 + $0x68] ss:$16 sps:$4 sm:$0xff]  }
  0x70   : > { %v1719_v17 = vld [vmem:[#allocation5 + $0x84] ss:$16 sps:$4 sm:$0xff]   ;;  %v1721_v18 = vld [vmem:[#allocation5 + $0x8c] ss:$16 sps:$4 sm:$0xff]   ;;  %v1723_v19 = vld [vmem:[#allocation5 + $0x80] ss:$16 sps:$4 sm:$0xff]  }
  0x71   : > { %541 = vmatpush1.bf16.msra.mxu0 %v1705_v7  ;;  %614 = vmatpush1.bf16.msra.mxu1 %v1706_v8  ;;  %v1724_v20 = vld [vmem:[#allocation5 + $0x88] ss:$16 sps:$4 sm:$0xff]   ;;  %v1725_v21 = vld [vmem:[#allocation5 + $0xa4] ss:$16 sps:$4 sm:$0xff]   ;;  %v1727_v22 = vld [vmem:[#allocation5 + $0xac] ss:$16 sps:$4 sm:$0xff]  }
  0x72   : > { %542 = vmatprep.subr.bf16.mxu0 %v1707_v9  ;;  %615 = vmatprep.subr.bf16.mxu1 %v1709_v10  ;;  %v1729_v23 = vld [vmem:[#allocation5 + $0xa0] ss:$16 sps:$4 sm:$0xff]   ;;  %v1730_v24 = vld [vmem:[#allocation5 + $0xa8] ss:$16 sps:$4 sm:$0xff]   ;;  %v1731_v25 = vld [vmem:[#allocation5 + $0xc4] ss:$16 sps:$4 sm:$0xff]  }
  0x73   : > { %v1733_v26 = vld [vmem:[#allocation5 + $0xcc] ss:$16 sps:$4 sm:$0xff]   ;;  %v1735_v27 = vld [vmem:[#allocation5 + $0xc0] ss:$16 sps:$4 sm:$0xff]   ;;  %v1736_v28 = vld [vmem:[#allocation5 + $0xc8] ss:$16 sps:$4 sm:$0xff]  }
  0x74   : > { %v1737_v29 = vld [vmem:[#allocation5 + $0xe4] ss:$16 sps:$4 sm:$0xff]   ;;  %v1739_v30 = vld [vmem:[#allocation5 + $0xec] ss:$16 sps:$4 sm:$0xff]   ;;  %v1741_v31 = vld [vmem:[#allocation5 + $0xe0] ss:$16 sps:$4 sm:$0xff]  }
  0x75   : > { %543 = vmatpush1.bf16.msra.mxu0 %v1711_v11  ;;  %616 = vmatpush1.bf16.msra.mxu1 %v1712_v12  ;;  %v1742_v32 = vld [vmem:[#allocation5 + $0xe8] ss:$16 sps:$4 sm:$0xff]   ;;  %v2243_v33 = vld [vmem:[%s2230_s14] sm:$0xff]   ;;  %v2253_v43 = vld [vmem:[%s2230_s14 + $0x10] sm:$0xff]   ;;  %v319_v6 = vshrl.u32 %v318_v5, 7  ;;  %s1322_s28 = sshll.u32 %s2458_s10, 4  ;;  %s2475_s28 = int_to_ptr.vmem [resolvable:$true] %s1322_s28 }
  0x76   : > { %544 = vmatprep.subr.bf16.mxu0 %v1713_v13  ;;  %617 = vmatprep.subr.bf16.mxu1 %v1715_v14  ;;  %v1747_v34 = vld [vmem:[#allocation7 + $0x40] sm:$0xff]   ;;  %v1751_v38 = vld [vmem:[#allocation7 + $0x48] sm:$0xff]   ;;  %v2264_v44 = vld [vmem:[%s2230_s14 + $0x18] sm:$0xff]   ;;  %s1517_s15 = sshll.u32 %s2067_s22, 9  ;;  %s1309_s23 = scalar_lea.sflag [#allocation4], %s2224_s17 }
  0x77   : > { %v1749_v35 = vld [vmem:[#allocation7 + $0xc0] sm:$0xff]   ;;  %v1753_v39 = vld [vmem:[#allocation7 + $0xc8] sm:$0xff]   ;;  %v1755_v45 = vld [vmem:[#allocation7 + $0x50] sm:$0xff]   ;;  %v2271_v9 = vsub.s32 0, %v319_v6  ;;  %v328_v10 = vsub.s32 4, %v319_v6  ;;  %v324_v11 = vsub.s32 2, %v319_v6  ;;  %s2480_s11 = scalar_lea.hbm %s2530_s5, %s1517_s15 }
  0x78   : > { %v1748_v36 = vld [vmem:[#allocation7] sm:$0xff]   ;;  %v2246_v40 = vld [vmem:[%s2230_s14 + $0x8] sm:$0xff]   ;;  %v1757_v46 = vld [vmem:[#allocation7 + $0xd0] sm:$0xff]   ;;  %v332_v12 = vsub.s32 6, %v319_v6  ;;  %s1933_s7 = scalar_lea.vmem %s2475_s28, 512  ;;  %p2544_p0 = scmp.ne.s32.totalorder %s2539_s29, 0 }
  0x79   : > { %545 = vmatpush1.bf16.msra.mxu0 %v1717_v15  ;;  %618 = vmatpush1.bf16.msra.mxu1 %v1718_v16  ;;  %v1750_v37 = vld [vmem:[#allocation7 + $0x80] sm:$0xff]   ;;  %v1752_v41 = vld [vmem:[#allocation7 + $0x8] sm:$0xff]   ;;  %v1756_v47 = vld [vmem:[#allocation7 + $0x10] sm:$0xff]   ;;  %p1934_p11 = scmp.ne.s32.totalorder %s2475_s28, %s1933_s7  ;;  %s2013_s22 = smov [#allocation8]  }
  0x7a   : > { %546 = vmatprep.subr.bf16.mxu0 %v1719_v17  ;;  %619 = vmatprep.subr.bf16.mxu1 %v1721_v18  ;;  %v1754_v42 = vld [vmem:[#allocation7 + $0x88] sm:$0xff]   ;;  %v1758_v48 = vld [vmem:[#allocation7 + $0x90] sm:$0xff]   ;;  %v1759_v49 = vld [vmem:[#allocation7 + $0x58] sm:$0xff]   ;;  %s1937_s6 = sshll.u32 %s2013_s22, 4  ;;  %s1938_s6 = int_to_ptr.vmem [resolvable:$false] %s1937_s6 }
  0x7b   : > { %v1761_v50 = vld [vmem:[#allocation7 + $0xd8] sm:$0xff]   ;;  %v1763_v53 = vld [vmem:[#allocation7 + $0x60] sm:$0xff]   ;;  %v1767_v57 = vld [vmem:[#allocation7 + $0x68] sm:$0xff]   ;;  %p1935_p1 = pnand %p1934_p11, %p2544_p0  ;;  %s1939_s8 = scalar_lea.vmem %s1938_s6, 1024 }
  0x7c   : > { %v1760_v51 = vld [vmem:[#allocation7 + $0x18] sm:$0xff]   ;;  %v1765_v54 = vld [vmem:[#allocation7 + $0xe0] sm:$0xff]   ;;  %v1769_v58 = vld [vmem:[#allocation7 + $0xe8] sm:$0xff]   ;;  %p1940_p5 = scmp.lt.s32.totalorder %s2475_s28, %s1938_s6  ;;  %p1941_p9 = scmp.lt.s32.totalorder %s1939_s8, %s1933_s7 }
  0x7d   : > { %547 = vmatpush1.bf16.msra.mxu0 %v1723_v19  ;;  %620 = vmatpush1.bf16.msra.mxu1 %v1724_v20  ;;  %v1762_v52 = vld [vmem:[#allocation7 + $0x98] sm:$0xff]   ;;  %v1764_v55 = vld [vmem:[#allocation7 + $0x20] sm:$0xff]   ;;  %v1768_v59 = vld [vmem:[#allocation7 + $0x28] sm:$0xff]   ;;  %p1936_p3 = pneg %p1935_p1 }
  0x7e   : > { %548 = vmatprep.subr.bf16.mxu0 %v1725_v21  ;;  %621 = vmatprep.subr.bf16.mxu1 %v1727_v22  ;;  %v1766_v56 = vld [vmem:[#allocation7 + $0xa0] sm:$0xff]   ;;  %v1770_v60 = vld [vmem:[#allocation7 + $0xa8] sm:$0xff]   ;;  %v1771_v61 = vld [vmem:[#allocation7 + $0x70] sm:$0xff]   ;;  %p1942_p12 = por %p1941_p9, %p1940_p5 }
  0x7f   : > { %v1773_v62 = vld [vmem:[#allocation7 + $0xf0] sm:$0xff]   ;;  %v1775_v1 = vld [vmem:[#allocation7 + $0x78] sm:$0xff]   ;;  %v315_v7 = vld [vmem:[%s2527_s2] sm:$0xf] }
  0x80   : > { %v1772_v63 = vld [vmem:[#allocation7 + $0x30] sm:$0xff]   ;;  %v1777_v2 = vld [vmem:[#allocation7 + $0xf8] sm:$0xff]   ;;  %v316_v8 = vunpack.c.l.bf16 %v315_v7  ;;  %p1943_p2 = pnand %p1942_p12, %p1936_p3 }
  0x81   : > { %549 = vmatpush1.bf16.msra.mxu0 %v1729_v23  ;;  %622 = vmatpush1.bf16.msra.mxu1 %v1730_v24  ;;  %v1776_v3 = vld [vmem:[#allocation7 + $0x38] sm:$0xff]  }
  0x82   : > { %550 = vmatprep.subr.bf16.mxu0 %v1731_v25  ;;  %623 = vmatprep.subr.bf16.mxu1 %v1733_v26  ;;  %v1778_v4 = vld [vmem:[#allocation7 + $0xb8] sm:$0xff]   ;;  %v321_v13 = vrot.slane %v316_v8, %v2271_v9  ;;  %v329_v14 = vrot.slane %v316_v8, %v328_v10  ;;  %v325_v15 = vrot.slane %v316_v8, %v324_v11 }
  0x83   : > { %v333_v16 = vrot.slane %v316_v8, %v332_v12 }
  0x84   : > { %v2275_v17 = vrot.slane %v321_v13, %v2271_v9  ;;  %v2278_v18 = vrot.slane %v329_v14, %v2271_v9  ;;  %v2281_v19 = vrot.slane %v325_v15, %v2271_v9 }
  0x85   : > { %551 = vmatpush1.bf16.msra.mxu0 %v1735_v27  ;;  %624 = vmatpush1.bf16.msra.mxu1 %v1736_v28  ;;  %v2284_v20 = vrot.slane %v333_v16, %v2271_v9 }
  0x86   : > { %552 = vmatprep.subr.bf16.mxu0 %v1737_v29  ;;  %625 = vmatprep.subr.bf16.mxu1 %v1739_v30 }
  0x89   : > { %553 = vmatpush1.bf16.msra.mxu0 %v1741_v31  ;;  %626 = vmatpush1.bf16.msra.mxu1 %v1742_v32 }
  0x8a   : > { %1541 = vmatprep.subr.bf16.mxu0 %v1747_v34  ;;  %1581 = vmatprep.subr.bf16.mxu1 %v1749_v35 }
  0x8c   : > { %571 = vmatmul.mubr.bf16.vlgmr.msra.gmra.mrb[0].mxu0 %v2243_v33  ;;  %644 = vmatmul.mubr.bf16.vlgmr.msra.gmra.mrb[0].mxu1 %v2243_v33 }
  0x8d   : > { %580 = vmatprep.mubr.bf16.mxu0 %v2012_v0  ;;  %653 = vmatprep.mubr.bf16.mxu1 %v2012_v0 }
  0x8e   : > { %1542 = vmatpush3.bf16.msra.mxu0 %v1748_v36  ;;  %1582 = vmatpush3.bf16.msra.mxu1 %v1750_v37 }
  0x8f   : > { %1543 = vmatprep.subr.bf16.mxu0 %v1751_v38  ;;  %1583 = vmatprep.subr.bf16.mxu1 %v1753_v39 }
  0x92   : > { %1544 = vmatpush3.bf16.msra.mxu0 %v1752_v41  ;;  %1584 = vmatpush3.bf16.msra.mxu1 %v1754_v42 }
  0x93   : > { %1545 = vmatprep.subr.bf16.mxu0 %v1755_v45  ;;  %1585 = vmatprep.subr.bf16.mxu1 %v1757_v46 }
  0x94   : > { %581 = vmatmul.mubr.bf16.gmra.mrb[4].mxu0 %v2246_v40  ;;  %654 = vmatmul.mubr.bf16.gmra.mrb[4].mxu1 %v2246_v40 }
  0x95   : > { %590 = vmatprep.mubr.bf16.mxu0 %v2012_v0  ;;  %663 = vmatprep.mubr.bf16.mxu1 %v2012_v0 }
  0x96   : > { %1546 = vmatpush3.bf16.msra.mxu0 %v1756_v47  ;;  %1586 = vmatpush3.bf16.msra.mxu1 %v1758_v48 }
  0x97   : > { %1547 = vmatprep.subr.bf16.mxu0 %v1759_v49  ;;  %1587 = vmatprep.subr.bf16.mxu1 %v1761_v50 }
  0x9a   : > { %1548 = vmatpush3.bf16.msra.mxu0 %v1760_v51  ;;  %1588 = vmatpush3.bf16.msra.mxu1 %v1762_v52 }
  0x9b   : > { %1549 = vmatprep.subr.bf16.mxu0 %v1763_v53  ;;  %1589 = vmatprep.subr.bf16.mxu1 %v1765_v54 }
  0x9c   : > { %591 = vmatmul.mubr.bf16.gmra.mrb[8].mxu0 %v2253_v43  ;;  %664 = vmatmul.mubr.bf16.gmra.mrb[8].mxu1 %v2253_v43 }
  0x9d   : > { %600 = vmatprep.mubr.bf16.mxu0 %v2012_v0  ;;  %673 = vmatprep.mubr.bf16.mxu1 %v2012_v0  ;;  %v1774_v0 = vld [vmem:[#allocation7 + $0xb0] sm:$0xff]  }
  0x9e   : > { %1550 = vmatpush3.bf16.msra.mxu0 %v1764_v55  ;;  %1590 = vmatpush3.bf16.msra.mxu1 %v1766_v56 }
  0x9f   : > { %1551 = vmatprep.subr.bf16.mxu0 %v1767_v57  ;;  %1591 = vmatprep.subr.bf16.mxu1 %v1769_v58 }
  0xa2   : > { %1552 = vmatpush3.bf16.msra.mxu0 %v1768_v59  ;;  %1592 = vmatpush3.bf16.msra.mxu1 %v1770_v60 }
  0xa3   : > { %1553 = vmatprep.subr.bf16.mxu0 %v1771_v61  ;;  %1593 = vmatprep.subr.bf16.mxu1 %v1773_v62 }
  0xa4   : > { %601 = vmatmul.mubr.bf16.gmra.mrb[12].mxu0 %v2264_v44  ;;  %674 = vmatmul.mubr.bf16.gmra.mrb[12].mxu1 %v2264_v44 }
  0xa6   : > { %1554 = vmatpush3.bf16.msra.mxu0 %v1772_v63  ;;  %1594 = vmatpush3.bf16.msra.mxu1 %v1774_v0 }
  0xa7   : > { %1555 = vmatprep.subr.bf16.mxu0 %v1775_v1  ;;  %1595 = vmatprep.subr.bf16.mxu1 %v1777_v2 }
  0xaa   : > { %1556 = vmatpush3.bf16.msra.mxu0 %v1776_v3  ;;  %1596 = vmatpush3.bf16.msra.mxu1 %v1778_v4 }
 0x15f   : > { %v572_v21 = vpop.f32.mrb[0].mxu0  ;;  %v645_v22 = vpop.f32.mrb[0].mxu1 }
 0x160   : > { %v573_v23 = vadd.f32 %v572_v21, %v2275_v17  ;;  %v646_v24 = vadd.f32 %v645_v22, %v2278_v18  ;;  %v574_v25 = vpop.f32.mrb[1].mxu0  ;;  %v647_v26 = vpop.f32.mrb[1].mxu1 }
 0x161   : > { %v575_v27 = vadd.f32 %v574_v25, %v2281_v19  ;;  %v648_v28 = vadd.f32 %v647_v26, %v2284_v20  ;;  %v576_v29 = vpop.f32.mrb[2].mxu0  ;;  %v649_v30 = vpop.f32.mrb[2].mxu1 }
 0x162   : > { %v716_v31 = vmul.f32 0.70710677, %v573_v23  ;;  %v718_v32 = vmul.f32 0.70710677, %v646_v24  ;;  %v577_v36 = vadd.f32 %v576_v29, %v2275_v17  ;;  %v650_v37 = vadd.f32 %v649_v30, %v2278_v18  ;;  %v578_v38 = vpop.f32.mrb[3].mxu0  ;;  %v651_v39 = vpop.f32.mrb[3].mxu1 }
 0x163   : > { %v717_v34 = vmul.f32 0.70710677, %v575_v27  ;;  %v719_v35 = vmul.f32 0.70710677, %v648_v28  ;;  %v579_v41 = vadd.f32 %v578_v38, %v2281_v19  ;;  %v652_v42 = vadd.f32 %v651_v39, %v2284_v20 }
 0x164   : > { %1783 = verf.f32 %v716_v31  ;;  %v720_v45 = vmul.f32 0.70710677, %v577_v36  ;;  %v722_v46 = vmul.f32 0.70710677, %v650_v37  ;;  %v684_v63 = vmul.f32 0.5, %v573_v23 }
 0x165   : > { %1785 = verf.f32 %v718_v32  ;;  %v721_v47 = vmul.f32 0.70710677, %v579_v41  ;;  %v723_v49 = vmul.f32 0.70710677, %v652_v42  ;;  %v686_v6 = vmul.f32 0.5, %v646_v24 }
 0x166   : > { %1787 = verf.f32 %v717_v34  ;;  %v2301_v7 = vmul.f32 0.5, %v575_v27  ;;  %v2303_v8 = vmul.f32 0.5, %v648_v28  ;;  %v688_v12 = vmul.f32 0.5, %v577_v36 }
 0x167   : > { %1789 = verf.f32 %v719_v35  ;;  %v582_v48 = vpop.f32.mrb[4].mxu0  ;;  %v655_v51 = vpop.f32.mrb[4].mxu1  ;;  %v690_v21 = vmul.f32 0.5, %v650_v37  ;;  %v2305_v22 = vmul.f32 0.5, %v579_v41  ;;  %v2308_v27 = vmul.f32 0.5, %v652_v42 }
 0x168   : > { %1791 = verf.f32 %v720_v45  ;;  %v583_v50 = vadd.f32 %v582_v48, %v2275_v17  ;;  %v584_v52 = vpop.f32.mrb[5].mxu0  ;;  %v656_v53 = vadd.f32 %v655_v51, %v2278_v18  ;;  %v657_v55 = vpop.f32.mrb[5].mxu1 }
 0x169   : > { %1793 = verf.f32 %v722_v46  ;;  %v585_v54 = vadd.f32 %v584_v52, %v2281_v19  ;;  %v586_v56 = vpop.f32.mrb[6].mxu0  ;;  %v658_v58 = vadd.f32 %v657_v55, %v2284_v20  ;;  %v659_v59 = vpop.f32.mrb[6].mxu1 }
 0x16a   : > { %1795 = verf.f32 %v721_v47  ;;  %v724_v57 = vmul.f32 0.70710677, %v583_v50  ;;  %v588_v60 = vpop.f32.mrb[7].mxu0  ;;  %v726_v61 = vmul.f32 0.70710677, %v656_v53  ;;  %v661_v62 = vpop.f32.mrb[7].mxu1  ;;  %v587_v2 = vadd.f32 %v586_v56, %v2275_v17 }
 0x16b   : > { %1797 = verf.f32 %v723_v49  ;;  %v725_v0 = vmul.f32 0.70710677, %v585_v54  ;;  %v727_v1 = vmul.f32 0.70710677, %v658_v58  ;;  %v660_v3 = vadd.f32 %v659_v59, %v2278_v18 }
 0x16c   : > { %1799 = verf.f32 %v724_v57  ;;  %v589_v4 = vadd.f32 %v588_v60, %v2281_v19  ;;  %v728_v13 = vmul.f32 0.70710677, %v587_v2  ;;  %v662_v25 = vadd.f32 %v661_v62, %v2284_v20 }
 0x16d   : > { %1801 = verf.f32 %v726_v61  ;;  %v730_v23 = vmul.f32 0.70710677, %v660_v3  ;;  %v2310_v28 = vmul.f32 0.5, %v583_v50  ;;  %v2312_v35 = vmul.f32 0.5, %v656_v53 }
 0x16e   : > { %v1784_v5 = vpop.eup %1783  ;;  %1803 = verf.f32 %v725_v0  ;;  %v729_v29 = vmul.f32 0.70710677, %v589_v4  ;;  %v2314_v36 = vmul.f32 0.5, %v585_v54  ;;  %v2316_v37 = vmul.f32 0.5, %v658_v58 }
 0x16f   : > { %v1786_v10 = vpop.eup %1785  ;;  %v780_v11 = vadd.f32 1.0, %v1784_v5  ;;  %1805 = verf.f32 %v727_v1  ;;  %v592_v14 = vpop.f32.mrb[8].mxu0  ;;  %v731_v50 = vmul.f32 0.70710677, %v662_v25  ;;  %v2337_v0 = vmul.f32 0.5, %v660_v3 }
 0x170   : > { %v665_v15 = vpop.f32.mrb[8].mxu1  ;;  %v1788_v16 = vpop.eup %1787  ;;  %v782_v34 = vadd.f32 1.0, %v1786_v10  ;;  %1807 = verf.f32 %v728_v13  ;;  %v593_v51 = vadd.f32 %v592_v14, %v2275_v17  ;;  %v2339_v1 = vmul.f32 0.5, %v589_v4 }
 0x171   : > { %v594_v24 = vpop.f32.mrb[9].mxu0  ;;  %v1790_v26 = vpop.eup %1789  ;;  %v2320_v45 = vmul.f32 %v780_v11, %v684_v63  ;;  %v781_v42 = vadd.f32 1.0, %v1788_v16  ;;  %1809 = verf.f32 %v730_v23  ;;  %v666_v55 = vadd.f32 %v665_v15, %v2278_v18 }
 0x172   : > { %v667_v30 = vpop.f32.mrb[9].mxu1  ;;  %v596_v31 = vpop.f32.mrb[10].mxu0  ;;  %v783_v53 = vadd.f32 1.0, %v1790_v26  ;;  %1811 = verf.f32 %v729_v29  ;;  %v2328_v57 = vmul.f32 %v782_v34, %v686_v6  ;;  %v732_v59 = vmul.f32 0.70710677, %v593_v51 }
 0x173   : > { %v1792_v32 = vpop.eup %1791  ;;  %v669_v38 = vpop.f32.mrb[10].mxu1  ;;  %v595_v60 = vadd.f32 %v594_v24, %v2281_v19  ;;  %v2335_v63 = vmul.f32 0.5, %v587_v2  ;;  %v2343_v13 = vmul.f32 0.5, %v662_v25  ;;  %1813 = verf.f32 %v731_v50 }
 0x174   : > { %v2318_v39 = vpop.f32.mrb[11].mxu0  ;;  %v1794_v41 = vpop.eup %1793  ;;  %v784_v46 = vadd.f32 1.0, %v1792_v32  ;;  %v2346_v2 = vmul.f32 %v781_v42, %v2301_v7  ;;  %v2349_v3 = vmul.f32 %v783_v53, %v2303_v8  ;;  %1815 = verf.f32 %v732_v59 }
 0x175   : > { %v2322_v47 = vpop.f32.mrb[11].mxu1  ;;  %v1796_v48 = vpop.eup %1795  ;;  %v786_v49 = vadd.f32 1.0, %v1794_v41  ;;  %v734_v4 = vmul.f32 0.70710677, %v666_v55  ;;  %v733_v25 = vmul.f32 0.70710677, %v595_v60  ;;  %v668_v29 = vadd.f32 %v667_v30, %v2284_v20 }
 0x176   : > { %v1798_v52 = vpop.eup %1797  ;;  %v2325_v54 = vmul.f32 %v784_v46, %v688_v12  ;;  %v785_v12 = vadd.f32 1.0, %v1796_v48  ;;  %v597_v8 = vadd.f32 %v596_v31, %v2275_v17  ;;  %v670_v41 = vadd.f32 %v669_v38, %v2278_v18 }
 0x177   : > { %v1800_v56 = vpop.eup %1799  ;;  %v2330_v58 = vmul.f32 %v786_v49, %v690_v21  ;;  %v602_v5 = vpop.f32.mrb[12].mxu0  ;;  %v787_v24 = vadd.f32 1.0, %v1798_v52  ;;  %1817 = verf.f32 %v734_v4  ;;  %v2363_v49 = vmul.f32 0.5, %v593_v51 }
 0x178   : > { %v1802_v61 = vpop.eup %1801  ;;  %v844_v62 = vpack.c.bf16 %v2325_v54, %v2320_v45  ;;  %v675_v10 = vpop.f32.mrb[12].mxu1  ;;  %v788_v26 = vadd.f32 1.0, %v1800_v56  ;;  %v817_v42 = vmul.f32 %v785_v12, %v2305_v22  ;;  %v2365_v52 = vmul.f32 0.5, %v666_v55 }
 0x179   : > { %v1804_v11 = vpop.eup %1803  ;;  %v846_v6 = vpack.c.bf16 %v2330_v58, %v2328_v57  ;;  %v604_v14 = vpop.f32.mrb[13].mxu0  ;;  %v790_v7 = vadd.f32 1.0, %v1802_v61  ;;  %1819 = verf.f32 %v733_v25  ;;  %v735_v30 = vmul.f32 0.70710677, %v668_v29 }
 0x17a   : > { %v677_v15 = vpop.f32.mrb[13].mxu1  ;;  %v1806_v16 = vpop.eup %1805  ;;  %v789_v46 = vadd.f32 1.0, %v1804_v11  ;;  %v736_v53 = vmul.f32 0.70710677, %v597_v8  ;;  %v819_v59 = vmul.f32 %v787_v24, %v2308_v27  ;;  %v2369_v61 = vmul.f32 %v788_v26, %v2310_v28 }
 0x17b   : > { %v2351_v21 = vpop.f32.mrb[14].mxu0  ;;  %v2353_v23 = vpop.f32.mrb[14].mxu1  ;;  %v791_v48 = vadd.f32 1.0, %v1806_v16  ;;  %v2371_v31 = vmul.f32 0.5, %v595_v60  ;;  %v738_v38 = vmul.f32 0.70710677, %v670_v41  ;;  %v2374_v11 = vmul.f32 %v790_v7, %v2312_v35 }
 0x17c   : > { %v2356_v32 = vpop.f32.mrb[15].mxu0  ;;  %v2358_v34 = vpop.f32.mrb[15].mxu1  ;;  %1821 = verf.f32 %v735_v30  ;;  %v599_v51 = vadd.f32 %v2318_v39, %v2281_v19  ;;  %v672_v55 = vadd.f32 %v2322_v47, %v2284_v20  ;;  %v2381_v12 = vmul.f32 %v789_v46, %v2314_v36 }
 0x17d   : > { %v1808_v50 = vpop.eup %1807  ;;  %v2384_v27 = vmul.f32 %v791_v48, %v2316_v37  ;;  %1823 = verf.f32 %v736_v53  ;;  %v2387_v28 = vadd.f32 %v602_v5, %v2275_v17  ;;  %v2389_v35 = vmul.f32 0.5, %v668_v29 }
 0x17e   : > { %v1810_v56 = vpop.eup %1809  ;;  %v792_v60 = vadd.f32 1.0, %v1808_v50  ;;  %1825 = verf.f32 %v738_v38  ;;  %v737_v16 = vmul.f32 0.70710677, %v599_v51  ;;  %v704_v26 = vmul.f32 0.5, %v597_v8 }
 0x17f   : > { %v1812_v22 = vpop.eup %1811  ;;  %v794_v39 = vadd.f32 1.0, %v1810_v56  ;;  %v739_v47 = vmul.f32 0.70710677, %v672_v55  ;;  %v740_v36 = vmul.f32 0.70710677, %v2387_v28  ;;  %v2393_v37 = vadd.f32 %v675_v10, %v2278_v18 }
 0x180   : > { %v1814_v4 = vpop.eup %1813  ;;  %v793_v24 = vadd.f32 1.0, %v1812_v22  ;;  %1827 = verf.f32 %v737_v16  ;;  %v2396_v5 = vadd.f32 %v604_v14, %v2281_v19  ;;  %v2399_v29 = vadd.f32 %v677_v15, %v2284_v20 }
 0x181   : > { %v1816_v25 = vpop.eup %1815  ;;  %1829 = verf.f32 %v739_v47  ;;  %v845_v7 = vpack.c.bf16 %v817_v42, %v2346_v2  ;;  %v847_v46 = vpack.c.bf16 %v819_v59, %v2349_v3  ;;  %v824_v48 = vmul.f32 %v792_v60, %v2335_v63 }
 0x182   : > { %v1818_v8 = vpop.eup %1817  ;;  %v795_v50 = vadd.f32 1.0, %v1814_v4  ;;  %v706_v30 = vmul.f32 0.5, %v670_v41  ;;  %v742_v53 = vmul.f32 0.70710677, %v2393_v37  ;;  %v826_v10 = vmul.f32 %v794_v39, %v2337_v0 }
 0x183   : > { %v825_v14 = vmul.f32 %v793_v24, %v2339_v1  ;;  %v796_v56 = vadd.f32 1.0, %v1816_v25  ;;  %v741_v38 = vmul.f32 0.70710677, %v2396_v5  ;;  %1154 = vmatprep.mubr.bf16.mxu0 %v845_v7  ;;  %1219 = vmatprep.mubr.bf16.mxu1 %v847_v46  ;;  %v1820_v15 = vpop.eup %1819  ;;  %v705_v2 = vmul.f32 0.5, %v599_v51 }
 0x184   : > { %1831 = verf.f32 %v740_v36  ;;  %v743_v3 = vmul.f32 0.70710677, %v2399_v29  ;;  %v2411_v63 = vadd.f32 %v2351_v21, %v2275_v17  ;;  %1155 = vmatmul.mubr.bf16.vlgmr.msra.gmra.mrb[16].mxu0 %v844_v62  ;;  %1220 = vmatmul.mubr.bf16.vlgmr.msra.gmra.mrb[16].mxu1 %v846_v6  ;;  %v798_v0 = vadd.f32 1.0, %v1818_v8 }
 0x185   : > { %1833 = verf.f32 %v742_v53  ;;  %v680_v1 = vadd.f32 %v2353_v23, %v2278_v18  ;;  %v2423_v41 = vadd.f32 %v2356_v32, %v2281_v19  ;;  %v827_v17 = vmul.f32 %v795_v50, %v2343_v13 }
 0x186   : > { %v1822_v42 = vpop.eup %1821  ;;  %v707_v21 = vmul.f32 0.5, %v672_v55  ;;  %1835 = verf.f32 %v741_v38  ;;  %v744_v45 = vmul.f32 0.70710677, %v2411_v63  ;;  %v828_v57 = vmul.f32 %v796_v56, %v2363_v49 }
 0x187   : > { %v1824_v54 = vpop.eup %1823  ;;  %v797_v58 = vadd.f32 1.0, %v1820_v15  ;;  %1837 = verf.f32 %v743_v3  ;;  %v746_v62 = vmul.f32 0.70710677, %v680_v1  ;;  %v745_v18 = vmul.f32 0.70710677, %v2423_v41 }
 0x188   : > { %v1826_v6 = vpop.eup %1825  ;;  %v800_v59 = vadd.f32 1.0, %v1824_v54  ;;  %1839 = verf.f32 %v744_v45  ;;  %v682_v19 = vadd.f32 %v2358_v34, %v2284_v20  ;;  %v830_v13 = vmul.f32 %v798_v0, %v2365_v52 }
 0x189   : > { %v802_v23 = vadd.f32 1.0, %v1826_v6  ;;  %1841 = verf.f32 %v746_v62  ;;  %v849_v32 = vpack.c.bf16 %v825_v14, %v2381_v12  ;;  %v799_v51 = vadd.f32 1.0, %v1822_v42 }
 0x18a   : > { %v1828_v22 = vpop.eup %1827  ;;  %v832_v49 = vmul.f32 %v800_v59, %v704_v26  ;;  %1843 = verf.f32 %v745_v18  ;;  %v747_v55 = vmul.f32 0.70710677, %v682_v19  ;;  %v851_v39 = vpack.c.bf16 %v827_v17, %v2384_v27 }
 0x18b   : > { %v1830_v60 = vpop.eup %1829  ;;  %v834_v16 = vmul.f32 %v802_v23, %v706_v30  ;;  %v801_v4 = vadd.f32 1.0, %v1828_v22  ;;  %1162 = vmatprep.mubr.bf16.mxu0 %v849_v32  ;;  %v848_v24 = vpack.c.bf16 %v824_v48, %v2369_v61  ;;  %v850_v34 = vpack.c.bf16 %v826_v10, %v2374_v11 }
 0x18c   : > { %v803_v20 = vadd.f32 1.0, %v1830_v60  ;;  %1845 = verf.f32 %v747_v55  ;;  %v852_v52 = vpack.c.bf16 %v832_v49, %v828_v57  ;;  %v829_v12 = vmul.f32 %v797_v58, %v2371_v31  ;;  %1227 = vmatprep.mubr.bf16.mxu1 %v851_v39 }
 0x18d   : > { %v833_v47 = vmul.f32 %v801_v4, %v705_v2  ;;  %1163 = vmatmul.mubr.bf16.gmra.mrb[20].mxu0 %v848_v24  ;;  %v854_v26 = vpack.c.bf16 %v834_v16, %v830_v13  ;;  %v831_v36 = vmul.f32 %v799_v51, %v2389_v35  ;;  %1228 = vmatmul.mubr.bf16.gmra.mrb[20].mxu1 %v850_v34  ;;  %v708_v30 = vmul.f32 0.5, %v2387_v28 }
 0x18e   : > { %v1832_v25 = vpop.eup %1831  ;;  %v835_v7 = vmul.f32 %v803_v20, %v707_v21  ;;  %v710_v10 = vmul.f32 0.5, %v2393_v37  ;;  %v712_v35 = vmul.f32 0.5, %v2411_v63  ;;  %v709_v15 = vmul.f32 0.5, %v2396_v5 }
 0x18f   : > { %v1834_v46 = vpop.eup %1833  ;;  %v853_v27 = vpack.c.bf16 %v833_v47, %v829_v12  ;;  %v804_v50 = vadd.f32 1.0, %v1832_v25  ;;  %v714_v2 = vmul.f32 0.5, %v680_v1  ;;  %v713_v0 = vmul.f32 0.5, %v2423_v41 }
 0x190   : > { %v1836_v8 = vpop.eup %1835  ;;  %v855_v61 = vpack.c.bf16 %v835_v7, %v831_v36  ;;  %v806_v31 = vadd.f32 1.0, %v1834_v46  ;;  %v711_v37 = vmul.f32 0.5, %v2399_v29  ;;  %v715_v58 = vmul.f32 0.5, %v682_v19  ;;  %v924_v29 = vld [vmem:[%s2529_s4] sm:$0x1] }
 0x191   : > { %v1838_v48 = vpop.eup %1837  ;;  %1170 = vmatprep.mubr.bf16.mxu0 %v853_v27  ;;  %v805_v14 = vadd.f32 1.0, %v1836_v8  ;;  %v836_v42 = vmul.f32 %v804_v50, %v708_v30  ;;  %v925_v23 = vunpack.c.l.bf16 %v924_v29  ;;  %v1252_v20 = vunpack.c.l.bf16 %v2243_v33 }
 0x192   : > { %v1840_v11 = vpop.eup %1839  ;;  %1235 = vmatprep.mubr.bf16.mxu1 %v855_v61  ;;  %v807_v17 = vadd.f32 1.0, %v1838_v48  ;;  %v838_v54 = vmul.f32 %v806_v31, %v710_v10  ;;  %v1253_v47 = vunpack.c.h.bf16 %v2243_v33  ;;  %v1254_v10 = vunpack.c.l.bf16 %v2246_v40 }
 0x193   : > { %v1842_v53 = vpop.eup %1841  ;;  %v808_v56 = vadd.f32 1.0, %v1840_v11  ;;  %v837_v63 = vmul.f32 %v805_v14, %v709_v15  ;;  %v2448_v22 = vrot.slane %v925_v23, %v2271_v9 }
 0x194   : > { %v1844_v38 = vpop.eup %1843  ;;  %v810_v3 = vadd.f32 1.0, %v1842_v53  ;;  %v839_v59 = vmul.f32 %v807_v17, %v711_v37 }
 0x195   : > { %v840_v21 = vmul.f32 %v808_v56, %v712_v35  ;;  %v809_v28 = vadd.f32 1.0, %v1844_v38  ;;  %1171 = vmatmul.mubr.bf16.gmra.mrb[24].mxu0 %v852_v52  ;;  %1236 = vmatmul.mubr.bf16.gmra.mrb[24].mxu1 %v854_v26  ;;  %v1255_v38 = vunpack.c.h.bf16 %v2246_v40 }
 0x196   : > { %v1846_v45 = vpop.eup %1845  ;;  %v842_v57 = vmul.f32 %v810_v3, %v714_v2 }
 0x197   : > { %v841_v62 = vmul.f32 %v809_v28, %v713_v0  ;;  %v811_v6 = vadd.f32 1.0, %v1846_v45  ;;  %v856_v5 = vpack.c.bf16 %v840_v21, %v836_v42 }
 0x198   : > { %v858_v1 = vpack.c.bf16 %v842_v57, %v838_v54 }
 0x199   : > { %v843_v18 = vmul.f32 %v811_v6, %v715_v58  ;;  %v857_v41 = vpack.c.bf16 %v841_v62, %v837_v63  ;;  %v1256_v62 = vunpack.c.l.bf16 %v2253_v43 }
 0x19b   : > { %1178 = vmatprep.mubr.bf16.mxu0 %v857_v41  ;;  %v859_v13 = vpack.c.bf16 %v843_v18, %v839_v59  ;;  %v1257_v18 = vunpack.c.h.bf16 %v2253_v43  ;;  %v1258_v43 = vunpack.c.l.bf16 %v2264_v44 }
 0x19d   : > { %1243 = vmatprep.mubr.bf16.mxu1 %v859_v13  ;;  %1179 = vmatmul.mubr.bf16.gmra.mrb[28].mxu0 %v856_v5 }
 0x19e   : > { %1244 = vmatmul.mubr.bf16.gmra.mrb[28].mxu1 %v858_v1 }
 0x257   : > { %v1557_v19 = vpop.f32.mrb[16].mxu0  ;;  %v1597_v32 = vpop.f32.mrb[16].mxu1 }
 0x258   : > { %v1558_v51 = vpop.f32.mrb[17].mxu0  ;;  %v1598_v49 = vpop.f32.mrb[17].mxu1 }
 0x259   : > { %v1559_v55 = vadd.f32 %v1558_v51, %v1557_v19  ;;  %v1599_v60 = vadd.f32 %v1598_v49, %v1597_v32  ;;  %v1560_v16 = vpop.f32.mrb[18].mxu0  ;;  %v1600_v4 = vpop.f32.mrb[18].mxu1 }
 0x25a   : > { %v1561_v39 = vpop.f32.mrb[19].mxu0  ;;  %v1601_v24 = vpop.f32.mrb[19].mxu1 }
 0x25b   : > { %v1157_v34 = vadd.f32 %v1559_v55, %v2448_v22  ;;  %v1562_v52 = vadd.f32 %v1561_v39, %v1560_v16  ;;  %v1602_v12 = vadd.f32 %v1601_v24, %v1600_v4 }
 0x25d   : > { %v1222_v26 = vadd.f32 %v1599_v60, %v1157_v34  ;;  %v1160_v9 = vadd.f32 %v1562_v52, %v2448_v22 }
 0x25f   : > { %v1260_v25 = vadd.f32 %v1252_v20, %v1222_v26  ;;  %v1225_v36 = vadd.f32 %v1602_v12, %v1160_v9  ;;  %v1259_v26 = vunpack.c.h.bf16 %v2264_v44 }
 0x260   : > { %v1563_v7 = vpop.f32.mrb[20].mxu0  ;;  %v1603_v27 = vpop.f32.mrb[20].mxu1 }
 0x261   : > { %v1261_v46 = vadd.f32 %v1253_v47, %v1225_v36  ;;  %v1564_v8 = vpop.f32.mrb[21].mxu0  ;;  %v1604_v48 = vpop.f32.mrb[21].mxu1 }
 0x262   : > { %v1565_v61 = vadd.f32 %v1564_v8, %v1563_v7  ;;  %v1566_v50 = vpop.f32.mrb[22].mxu0  ;;  %v1605_v30 = vadd.f32 %v1604_v48, %v1603_v27  ;;  %v1606_v31 = vpop.f32.mrb[22].mxu1 }
 0x263   : > { %v1521_v11 = vpack.c.bf16 %v1261_v46, %v1260_v25  ;;  %v1567_v53 = vpop.f32.mrb[23].mxu0  ;;  %v1607_v35 = vpop.f32.mrb[23].mxu1 }
 0x264   : > { %v1165_v33 = vadd.f32 %v1565_v61, %v2448_v22  ;;  %v1568_v14 = vadd.f32 %v1567_v53, %v1566_v50  ;;  %v1608_v56 = vadd.f32 %v1607_v35, %v1606_v31 }
 0x265   : > { %1522 = vst [vmem:[%s2458_s10] sm:$0xff] %v1521_v11  }
 0x266   : > { %v1230_v15 = vadd.f32 %v1605_v30, %v1165_v33  ;;  %v1168_v2 = vadd.f32 %v1568_v14, %v2448_v22 }
 0x268   : > { %v1262_v3 = vadd.f32 %v1254_v10, %v1230_v15  ;;  %v1233_v0 = vadd.f32 %v1608_v56, %v1168_v2  ;;  %v1569_v42 = vpop.f32.mrb[24].mxu0  ;;  %v1609_v17 = vpop.f32.mrb[24].mxu1 }
 0x269   : > { %v1570_v21 = vpop.f32.mrb[25].mxu0  ;;  %v1610_v54 = vpop.f32.mrb[25].mxu1 }
 0x26a   : > { %v1263_v28 = vadd.f32 %v1255_v38, %v1233_v0  ;;  %v1571_v45 = vadd.f32 %v1570_v21, %v1569_v42  ;;  %v1572_v37 = vpop.f32.mrb[26].mxu0  ;;  %v1611_v57 = vadd.f32 %v1610_v54, %v1609_v17  ;;  %v1612_v58 = vpop.f32.mrb[26].mxu1 }
 0x26b   : > { %v1573_v63 = vpop.f32.mrb[27].mxu0  ;;  %v1613_v1 = vpop.f32.mrb[27].mxu1 }
 0x26c   : > { %v1526_v6 = vpack.c.bf16 %v1263_v28, %v1262_v3  ;;  %v1173_v40 = vadd.f32 %v1571_v45, %v2448_v22  ;;  %v1574_v5 = vadd.f32 %v1573_v63, %v1572_v37  ;;  %v1614_v59 = vadd.f32 %v1613_v1, %v1612_v58 }
 0x26e   : > { %1538 = vst [vmem:[%s2458_s10 + $0x8] sm:$0xff] %v1526_v6   ;;  %v1238_v41 = vadd.f32 %v1611_v57, %v1173_v40  ;;  %v1176_v13 = vadd.f32 %v1574_v5, %v2448_v22 }
 0x270   : > { %v1264_v29 = vadd.f32 %v1256_v62, %v1238_v41  ;;  %v1241_v23 = vadd.f32 %v1614_v59, %v1176_v13  ;;  %v1575_v19 = vpop.f32.mrb[28].mxu0 }
 0x271   : > { %v1615_v32 = vpop.f32.mrb[28].mxu1  ;;  %v1576_v51 = vpop.f32.mrb[29].mxu0 }
 0x272   : > { %v1265_v49 = vadd.f32 %v1257_v18, %v1241_v23  ;;  %v1577_v55 = vadd.f32 %v1576_v51, %v1575_v19  ;;  %v1616_v60 = vpop.f32.mrb[29].mxu1  ;;  %v1578_v16 = vpop.f32.mrb[30].mxu0 }
 0x273   : > { %v1617_v4 = vadd.f32 %v1616_v60, %v1615_v32  ;;  %v1618_v39 = vpop.f32.mrb[30].mxu1  ;;  %v1579_v24 = vpop.f32.mrb[31].mxu0 }
 0x274   : > { %v1531_v20 = vpack.c.bf16 %v1265_v49, %v1264_v29  ;;  %v1181_v34 = vadd.f32 %v1577_v55, %v2448_v22  ;;  %v1580_v52 = vadd.f32 %v1579_v24, %v1578_v16  ;;  %v1619_v12 = vpop.f32.mrb[31].mxu1 }
 0x275   : > { %v1620_v47 = vadd.f32 %v1619_v12, %v1618_v39 }
 0x276   : > { %1539 = vst [vmem:[%s2458_s10 + $0x10] sm:$0xff] %v1531_v20   ;;  %v1246_v9 = vadd.f32 %v1617_v4, %v1181_v34  ;;  %v1184_v25 = vadd.f32 %v1580_v52, %v2448_v22 }
 0x278   : > { %v1266_v36 = vadd.f32 %v1258_v43, %v1246_v9  ;;  %v1249_v7 = vadd.f32 %v1620_v47, %v1184_v25 }
 0x27a   : > { %v1267_v46 = vadd.f32 %v1259_v26, %v1249_v7 }
 0x27c   : > { %v1536_v44 = vpack.c.bf16 %v1267_v46, %v1266_v36 }
 0x27e   : > { %1540 = vst [vmem:[%s2458_s10 + $0x18] sm:$0xff] %v1536_v44  }
 0x27f   : > { %1946 = shalt.err (!%p1943_p2)
}
 0x280   : > { %s1947_s14 = scalar_lea.hbm %s2480_s11, 512  ;;  %s1951_s12 = scalar_lea.hbm %s2530_s5, 1024 }
 0x281   : > { %p1948_p13 = scmp.ne.s32.totalorder %s2480_s11, %s1947_s14  ;;  %p1952_p4 = scmp.lt.u32.totalorder %s2480_s11, %s2530_s5 }
 0x282   : > { %p1953_p7 = scmp.lt.u32.totalorder %s1951_s12, %s1947_s14  ;;  %p1955_p11 = scmp.lt.u32.totalorder %s1947_s14, %s2480_s11 }
 0x283   : > { %p1949_p6 = pnand %p1948_p13, %p2544_p0 }
 0x284   : > { %p1954_p8 = por %p1953_p7, %p1952_p4 }
 0x285   : > { %p1950_p10 = pneg %p1949_p6 }
 0x286   : > { %p1956_p1 = por %p1955_p11, %p1954_p8 }
 0x288   : > { %p1957_p3 = pnand %p1956_p1, %p1950_p10 }
 0x28a   : > { %1960 = shalt.err (!%p1957_p3)
}
 0x28b   : > { %s2014_s15 = smov 64   ;;  %s2015_s9 = smov 4  }
 0x28c   : > { %1631 = dma.vmem_to_hbm [thread:$0]  (%p2544_p0), %s2475_s28, 512, %s2480_s11, %s1309_s23, %s2014_s15, %s2014_s15, %s2015_s9  }
 0x28d PF: > { %s1337_s30 = sand.u32 1, %s1991_s18   ;;  %p2545_p5 = scmp.ne.s32.totalorder %s2535_s25, 0 }
 0x28e   : > { %p2546_p9 = scmp.ge.s32.totalorder %s2003_s21, 2  ;;  %s1338_s7 = scalar_lea.sflag [#allocation4], %s1337_s30 }
 0x290   : > { %p1645_p12 = pnand %p2546_p9, %p2545_p5 }
 0x292   : > { %1986 = dma.done.wait (!%p1645_p12), %s1338_s7, 512  }
 0x293   : > { %1988 = vsyncadd (!%p1645_p12), %s1338_s7, 4294966784  ;;  %p19_p2 = scmp.ge.s32.totalorder %s2159_s16, 4   ;;  %s2547_s18 = smov %s1995_s19 }
 0x294   : > { %s2548_s19 = smov %s1999_s20  ;;  %s2549_s20 = smov %s2168_s27 }
 0x295   : > { %s2550_s21 = smov %s2159_s16  ;;  %21 = sbr.rel (!%p19_p2) target bundleno = 6 (0x6), region = 93 }
 0x29c   :  { %1343 = vsyncpa [#allocation3], 1 }
 0x29d   :  { %1345 = vsyncpa [#allocation3 + $0x1], 1 }
 0x29e   :  { %1346 = vsyncpa [#allocation6], 1 }
 0x29f   :  { %1347 = vsyncpa [#allocation4], 1 }
 0x2a0   :  { %1349 = vsyncpa [#allocation4 + $0x1], 1 }

</bundles_post_ra>
